<compile_context>
chip_gen: v5e
topology: v5e:2x2
jax: 0.10.0
libtpu: 0.0.40
codegen_flags: <defaults>
</compile_context>

<pallas_src>
from functools import partial

import jax
import jax.numpy as jnp
from jax import lax
from jax.experimental import pallas as pl
from jax.experimental.pallas import tpu as pltpu


def _sa_kernel(xa_ref, wf_ref, gamma_ref, o_ref, *, approx_recip=True):
    # xa_ref: (Bt, C+1, N)  channel-major input with an appended ones channel.
    # wf_ref: (2C+1, C+1)   fused weight [A; bk^T; w3|b3] (see module docstring).
    # gamma_ref: (1,) f32 in SMEM.   o_ref: (Bt, C, N).
    gamma = gamma_ref[0]
    wf = wf_ref[...]
    bt, cp1, n = xa_ref.shape
    c = cp1 - 1
    cdt = xa_ref.dtype          # operand/compute dtype (bf16 fast path when input is bf16)

    def body(b, carry):
        xa = xa_ref[b]                                              # (C+1, N)

        # Fused 1x1 convs (+ folded biases): one MXU matmul, depth C+1, N on lanes.
        y = jnp.dot(wf, xa, preferred_element_type=jnp.float32)     # (2C+1, N)
        ta = y[:c + 1, :].astype(cdt)                               # [A@x ; bk^T x]
        v = y[c + 1:, :].astype(cdt)                                # w3@x + b3

        # rel_T[j, i] = x_i^T A x_j + bk.x_j  (== q_i.k_j up to per-row-i constants,
        # which are softmax-invariant).  The ones channel of xa picks up the bias row.
        rel_t = lax.dot_general(ta, xa, (((0,), (0,)), ((), ())),
                                preferred_element_type=jnp.float32)  # (N_j, N_i)

        # Numerically-stable softmax over the key axis j (axis 0), in place.
        rel_t = rel_t - jnp.max(rel_t, axis=0, keepdims=True)
        rel_t = jnp.exp(rel_t)
        denom = jnp.sum(rel_t, axis=0, keepdims=True)
        if approx_recip:
            inv = pl.reciprocal(denom, approx=True)                  # EUP, ~1e-3 accurate
        else:
            inv = 1.0 / denom
        att_t = (rel_t * inv).astype(cdt)                            # (N_j, N_i)

        # refine[c, i] = sum_j v[c, j] * att_t[j, i] -- native (M,K)@(K,N) on the MXU,
        # the large (N, N) operand is consumed in its stored orientation (no transpose).
        refine = jnp.dot(v, att_t, preferred_element_type=jnp.float32)   # (C, N)

        x_res = xa[:c, :].astype(jnp.float32)
        o_ref[b] = (gamma * refine + x_res).astype(o_ref.dtype)
        return carry

    lax.fori_loop(0, bt, body, 0)


def _vmem_capacity_bytes():
    try:
        return int(pltpu.get_tpu_info().vmem_capacity_bytes)
    except Exception:
        return 64 * 1024 * 1024          # conservative (v7x physical VMEM)


def _tensorcores_per_chip():
    try:
        info = pltpu.get_tpu_info()
        for attr in ("num_cores", "core_count", "num_tensorcores", "tensorcore_count"):
            val = getattr(info, attr, None)
            if val:
                return int(val)
    except Exception:
        pass
    try:
        val = getattr(jax.devices()[0], "num_cores", None)
        if val:
            return int(val)
    except Exception:
        pass
    return 2                              # assume v7x-style 2 TCs when unknown


def _pick_block_batch(B, C, N, itemsize):
    """Largest per-step image count that fits the generation's VMEM budget."""
    budget = int(0.70 * _vmem_capacity_bytes())
    # One image's f32 temporaries inside the fori_loop (score matrix dominates).
    work = 4 * (2 * N * N + (2 * C + 1) * N + 2 * C * N)
    wbytes = 2 * (2 * C + 1) * (C + 1) * itemsize

    def need(bt):
        # double-buffered input + output blocks, plus the per-image working set
        return 2 * bt * ((C + 1) * N + C * N) * itemsize + work + wbytes

    divisors = [d for d in range(1, B + 1) if B % d == 0]
    fitting = [d for d in divisors if need(d) <= budget] or [1]
    if _tensorcores_per_chip() >= 2 and B >= 2:
        # keep >= 2 grid steps so both TensorCores (v7x) get work / pipeline overlaps
        multi = [d for d in fitting if B // d >= 2]
        bt = max(multi) if multi else max(fitting)
    else:
        # single-TC chips (v5e/v6e): the grid is a serial loop -> fewer, bigger steps
        bt = max(fitting)

    limit = int(min(max(2 * need(bt), 32 * 1024 * 1024),
                    max(budget, 32 * 1024 * 1024)))
    return bt, limit


def sa_module_pallas(feat_map, w1, b1, w2, b2, w3, b3, gamma, *, approx_recip=True):
    """feat_map: (B, C, H, W); w*: (Cout, Cin) == conv weight[:, :, 0, 0]; b*: (Cout,);
    gamma: (1,).  Returns (B, C, H, W).  approx_recip=True uses the EUP approximate
    reciprocal for the softmax denominator (intentional ~1e-3 deviation)."""
    B, C, H, W = feat_map.shape
    N = H * W
    cdt = feat_map.dtype

    # --- fused weight [A ; bk^T ; w3 | b3], built in f32 then cast to operand dtype ---
    w1f = w1.astype(jnp.float32)
    w2f = w2.astype(jnp.float32)
    w3f = w3.astype(jnp.float32)
    A = w1f.T @ w2f                                                 # (C, C)
    bk = w2f.T @ b1.astype(jnp.float32)                             # (C,)
    top = jnp.concatenate([A, bk[None, :]], axis=0)                 # (C+1, C)
    top = jnp.concatenate([top, jnp.zeros((C + 1, 1), jnp.float32)], axis=1)  # (C+1, C+1)
    bot = jnp.concatenate([w3f, b3.astype(jnp.float32)[:, None]], axis=1)     # (C, C+1)
    wf = jnp.concatenate([top, bot], axis=0).astype(cdt)            # (2C+1, C+1)

    # Channel-major x with an appended ones channel (folds biases into the matmul;
    # free reshape + one cheap channel concat, no full-tensor transpose; N on lanes).
    x = feat_map.reshape(B, C, N)
    xa = jnp.concatenate([x, jnp.ones((B, 1, N), cdt)], axis=1)     # (B, C+1, N)

    gamma_s = gamma.reshape(1).astype(jnp.float32)

    Bt, vmem_limit = _pick_block_batch(B, C, N, jnp.dtype(cdt).itemsize)

    out = pl.pallas_call(
        partial(_sa_kernel, approx_recip=approx_recip),
        out_shape=jax.ShapeDtypeStruct((B, C, N), cdt),
        grid_spec=pltpu.PrefetchScalarGridSpec(
            num_scalar_prefetch=0,
            grid=(B // Bt,),
            in_specs=[
                pl.BlockSpec((Bt, C + 1, N), lambda i: (i, 0, 0)),        # xa
                pl.BlockSpec((2 * C + 1, C + 1), lambda i: (0, 0)),       # fused weight
                pl.BlockSpec(memory_space=pltpu.MemorySpace.SMEM),        # gamma
            ],
            out_specs=pl.BlockSpec((Bt, C, N), lambda i: (i, 0, 0)),
        ),
        compiler_params=pltpu.CompilerParams(
            dimension_semantics=("parallel",),
            vmem_limit_bytes=vmem_limit,
        ),
    )(xa, wf, gamma_s)

    return out.reshape(B, C, H, W)


def sa_module_ref(feat_map, w1, b1, w2, b2, w3, b3, gamma):
    """Plain-JAX reference mirroring the PyTorch forward exactly (validates the
    fused-weight algebraic rewrite as well as the kernel)."""
    B, C, H, W = feat_map.shape
    N = H * W
    x = feat_map.reshape(B, C, N).astype(jnp.float32)
    q = jnp.einsum('oc,bcn->bon', w1, x) + b1[None, :, None]        # (B, C//8, N)
    k = jnp.einsum('oc,bcn->bon', w2, x) + b2[None, :, None]        # (B, C//8, N)
    v = jnp.einsum('oc,bcn->bon', w3, x) + b3[None, :, None]        # (B, C, N)
    rel = jnp.einsum('bei,bej->bij', q, k)                          # (B, N, N)
    att = jax.nn.softmax(rel, axis=-1)
    refine = jnp.einsum('bcj,bij->bci', v, att)                     # (B, C, N)
    out = gamma[0] * refine + x
    return out.reshape(B, C, H, W).astype(feat_map.dtype)


if __name__ == "__main__":
    # N = H*W = 256 keeps the output lane-dense (multiple of 128); B = 4 exercises
    # both the multi-image fori_loop path (Bt >= 2) and multiple grid steps.
    B, C, H, W = 4, 16, 16, 16
    C8 = C // 8

    key = jax.random.PRNGKey(0)
    k_x, k_w1, k_b1, k_w2, k_b2, k_w3, k_b3 = jax.random.split(key, 7)

    feat_map = jax.random.normal(k_x, (B, C, H, W), dtype=jnp.float32)

    # 1x1 conv weights stored as (Cout, Cin) == conv_weight[:, :, 0, 0]
    w1 = jax.random.normal(k_w1, (C8, C), dtype=jnp.float32) * 0.1
    b1 = jax.random.normal(k_b1, (C8,), dtype=jnp.float32) * 0.1
    w2 = jax.random.normal(k_w2, (C8, C), dtype=jnp.float32) * 0.1
    b2 = jax.random.normal(k_b2, (C8,), dtype=jnp.float32) * 0.1
    w3 = jax.random.normal(k_w3, (C, C), dtype=jnp.float32) * 0.1
    b3 = jax.random.normal(k_b3, (C,), dtype=jnp.float32) * 0.1
    # PyTorch inits gamma to 0 (output == input); use a nonzero value so the
    # attention path is actually exercised.
    gamma = jnp.full((1,), 0.5, dtype=jnp.float32)

    out = sa_module_pallas(feat_map, w1, b1, w2, b2, w3, b3, gamma)
    out = jax.block_until_ready(out)

    ref = sa_module_ref(feat_map, w1, b1, w2, b2, w3, b3, gamma)
    assert out.shape == (B, C, H, W)
    # Tolerance covers the EUP approximate softmax reciprocal (~1e-3) and the
    # (softmax-invariant) fused-weight rewrite's rounding differences.
    assert jnp.allclose(out, ref, atol=2e-3, rtol=2e-3), "mismatch vs reference"

    print("KERNEL_OK")
</pallas_src>

<mosaic_0001>
module attributes {stable_mosaic.version = 11 : i64} {
  func.func @_sa_kernel(%arg0: i32, %arg1: memref<2x17x256xf32, #tpu.memory_space<vmem>>, %arg2: memref<33x17xf32, #tpu.memory_space<vmem>>, %arg3: memref<1xf32, #tpu.memory_space<smem>>, %arg4: memref<2x16x256xf32, #tpu.memory_space<vmem>>) attributes {dimension_semantics = [#tpu.dimension_semantics<parallel>], iteration_bounds = array<i64: 2>, scalar_prefetch = 0 : i64, scratch_operands = 0 : i64, tpu.core_type = #tpu.core_type<tc>, window_params = [{transform_indices = @transform_0, window_bounds = array<i64: 2, 17, 256>}, {pipeline_mode = #tpu.pipeline_mode<synchronous>, transform_indices = @transform_1, window_bounds = array<i64: 33, 17>}, {transform_indices = @transform_2, window_bounds = array<i64: 1>}, {transform_indices = @transform_3, window_bounds = array<i64: 2, 16, 256>}]} {
    %c0 = arith.constant 0 : index
    %0 = memref.load %arg3[%c0] : memref<1xf32, #tpu.memory_space<smem>>
    %c0_0 = arith.constant 0 : index
    %c0_1 = arith.constant 0 : index
    %1 = vector.load %arg2[%c0_0, %c0_1] : memref<33x17xf32, #tpu.memory_space<vmem>>, vector<33x17xf32>
    %c0_i32 = arith.constant 0 : i32
    %c2_i32 = arith.constant 2 : i32
    %2 = arith.addi %c0_i32, %c2_i32 : i32
    %c1_i32 = arith.constant 1 : i32
    scf.for %arg5 = %c0_i32 to %2 step %c1_i32  : i32 {
      %3 = arith.index_cast %arg5 : i32 to index
      %c0_3 = arith.constant 0 : index
      %c0_4 = arith.constant 0 : index
      %4 = vector.load %arg1[%3, %c0_3, %c0_4] : memref<2x17x256xf32, #tpu.memory_space<vmem>>, vector<1x17x256xf32>
      %5 = vector.shape_cast %4 : vector<1x17x256xf32> to vector<17x256xf32>
      %cst = arith.constant dense<0.000000e+00> : vector<33x256xf32>
      %6 = tpu.matmul %1, %5, %cst {dimension_numbers = #tpu.dot_dimension_numbers<[1], [0], [0], [1], [0, 0, 1, 1], [], []>} : vector<33x17xf32>, vector<17x256xf32>, vector<33x256xf32> -> vector<33x256xf32>
      %7 = vector.extract_strided_slice %6 {offsets = [0, 0], sizes = [17, 256], strides = [1, 1]} : vector<33x256xf32> to vector<17x256xf32>
      %8 = vector.extract_strided_slice %6 {offsets = [17, 0], sizes = [16, 256], strides = [1, 1]} : vector<33x256xf32> to vector<16x256xf32>
      %cst_5 = arith.constant dense<0.000000e+00> : vector<256x256xf32>
      %9 = tpu.matmul %7, %5, %cst_5 {dimension_numbers = #tpu.dot_dimension_numbers<[0], [0], [1], [1], [0, 1, 1, 1], [], []>} : vector<17x256xf32>, vector<17x256xf32>, vector<256x256xf32> -> vector<256x256xf32>
      %cst_6 = arith.constant dense<0xFF800000> : vector<256xf32>
      %10 = vector.multi_reduction <maximumf>, %9, %cst_6 [0] : vector<256x256xf32> to vector<256xf32>
      %11 = vector.shape_cast %10 : vector<256xf32> to vector<1x256xf32>
      %12 = vector.broadcast %11 : vector<1x256xf32> to vector<256x256xf32>
      %13 = arith.subf %9, %12 : vector<256x256xf32>
      %14 = math.exp %13 : vector<256x256xf32>
      %cst_7 = arith.constant dense<0.000000e+00> : vector<256xf32>
      %15 = vector.multi_reduction <add>, %14, %cst_7 [0] : vector<256x256xf32> to vector<256xf32>
      %16 = vector.shape_cast %15 : vector<256xf32> to vector<1x256xf32>
      %17 = tpu.reciprocal %16 {approx = true} : vector<1x256xf32> -> vector<1x256xf32>
      %18 = vector.broadcast %17 : vector<1x256xf32> to vector<256x256xf32>
      %19 = arith.mulf %14, %18 : vector<256x256xf32>
      %cst_8 = arith.constant dense<0.000000e+00> : vector<16x256xf32>
      %20 = tpu.matmul %8, %19, %cst_8 {dimension_numbers = #tpu.dot_dimension_numbers<[1], [0], [0], [1], [0, 0, 1, 1], [], []>} : vector<16x256xf32>, vector<256x256xf32>, vector<16x256xf32> -> vector<16x256xf32>
      %21 = vector.extract_strided_slice %5 {offsets = [0, 0], sizes = [16, 256], strides = [1, 1]} : vector<17x256xf32> to vector<16x256xf32>
      %22 = vector.broadcast %0 : f32 to vector<16x256xf32>
      %23 = arith.mulf %22, %20 : vector<16x256xf32>
      %24 = arith.addf %23, %21 : vector<16x256xf32>
      %25 = arith.index_cast %arg5 : i32 to index
      %c0_9 = arith.constant 0 : index
      %c0_10 = arith.constant 0 : index
      %26 = vector.load %arg4[%25, %c0_9, %c0_10] : memref<2x16x256xf32, #tpu.memory_space<vmem>>, vector<1x16x256xf32>
      %27 = vector.shape_cast %26 : vector<1x16x256xf32> to vector<16x256xf32>
      %28 = vector.shape_cast %24 : vector<16x256xf32> to vector<1x16x256xf32>
      tpu.vector_store %arg4[%25, %c0_9, %c0_10], %28 {strides = array<i32>} : memref<2x16x256xf32, #tpu.memory_space<vmem>>, vector<1x16x256xf32>,
    }
    %c2_i32_2 = arith.constant 2 : i32
    return
  }
  func.func @transform_0(%arg0: i32) -> (i32, i32, i32) {
    %c0_i32 = arith.constant 0 : i32
    %c0_i32_0 = arith.constant 0 : i32
    %c0_i32_1 = arith.constant 0 : i32
    return %arg0, %c0_i32, %c0_i32_0 : i32, i32, i32
  }
  func.func @transform_1(%arg0: i32) -> (i32, i32) {
    %c0_i32 = arith.constant 0 : i32
    %c0_i32_0 = arith.constant 0 : i32
    %c0_i32_1 = arith.constant 0 : i32
    return %c0_i32, %c0_i32_0 : i32, i32
  }
  func.func @transform_2(%arg0: i32) -> i32 {
    %c0_i32 = arith.constant 0 : i32
    %c0_i32_0 = arith.constant 0 : i32
    return %c0_i32 : i32
  }
  func.func @transform_3(%arg0: i32) -> (i32, i32, i32) {
    %c0_i32 = arith.constant 0 : i32
    %c0_i32_0 = arith.constant 0 : i32
    %c0_i32_1 = arith.constant 0 : i32
    return %arg0, %c0_i32, %c0_i32_0 : i32, i32, i32
  }
}

</mosaic_0001>

<bundles_post_ra>
// kernel: tpu_custom_call.1
= control target key start
LH: loop header
LB: loop body
LE: loop exit
PB: predicated region body
PF: predicated region fallthrough
CT: control target
= control target key end

     0   :  { %s2595_s0 = inlined_call_operand.vmem [shape: f32[4,17,256], index: 0, kind: input, shape index: {}]   ;;  %s2596_s1 = inlined_call_operand.vmem [shape: f32[33,17], index: 1, kind: input, shape index: {}]   ;;  %s2597_s2 = inlined_call_operand.<no memory space> [shape: f32[1], index: 2, kind: input, shape index: {}]   ;;  %s2598_s3 = inlined_call_operand.hbm [shape: f32[4,16,256], index: 3, kind: output, shape index: {}]  }
   0x1   :  { %8 = sst [smem:[#allocation2]] %s2597_s2 }
   0x2   :  { %9 = vsyncpa [#allocation4], 0 }
   0x3   :  { %11 = vsyncpa [#allocation4 + $0x1], 0  ;;  %s1681_s14 = smov 0   ;;  %s1683_s15 = smov 0  }
   0x4   :  { %s1685_s16 = smov 0   ;;  %s1687_s17 = smov 0  }
   0x5 LB: > { %s1702_s2 = sadd.s32 4294967295, %s1650_s17   ;;  %s1293_s18 = sadd.s32 4294967294, %s1650_s17   ;;  %s1650_s17 = sphi %s1687_s17, %s2714_s17   ;;  %s1646_s16 = sphi %s1685_s16, %s2713_s16   ;;  %s1642_s15 = sphi %s1683_s15, %s2712_s15   ;;  %s1638_s14 = sphi %s1681_s14, %s2711_s14  }
   0x6   : > { %s1706_s19 = sadd.s32 1, %s1650_s17   ;;  %s92_s20 = sadd.s32 1, %s1646_s16 }
   0x7   : > { %s89_s21 = ssub.s32 %s1650_s17, %s1706_s19  ;;  %p102_p0 = scmp.ne.s32.totalorder %s1646_s16, %s1642_s15 }
   0x8   : > { %p90_p1 = scmp.eq.s32.totalorder %s89_s21, 0  ;;  %p103_p2 = scmp.eq.s32.totalorder %s1702_s2, 1 }
   0x9   : > { %p108_p3 = scmp.ne.s32.totalorder %s1642_s15, %s1638_s14  ;;  %p109_p4 = scmp.eq.s32.totalorder %s1293_s18, 1 }
   0xa   : > { %s1717_s22 = scalar_select %p90_p1, %s1646_s16, %s92_s20  }
   0xb   : > { %p1719_p5 = por %p103_p2, %p102_p0  ;;  %p1723_p6 = por %p109_p4, %p108_p3 }
   0xc   : > { %p1296_p7 = scmp.ge.s32.totalorder %s1650_s17, 1  ;;  %p143_p8 = scmp.lt.s32.totalorder %s1650_s17, 3 }
   0xe   : > { %p144_p9 = pnand %p1296_p7, %p143_p8 }
  0x10   : > { %147 = sbr.rel (%p144_p9) target bundleno = 1026 (0x402), region = 32 }
  0x15   : > { %s165_s25 = sand.u32 1, %s1642_s15   ;;  %s1298_s26 = sshll.u32 %s1702_s2, 1  ;;  %v1734_v0 = vld [vmem:[%s2596_s1] sm:$0xff]  ;;  %v1739_v1 = vld [vmem:[%s2596_s1 + $0x8] sm:$0xff]  ;;  %v1744_v2 = vld [vmem:[%s2596_s1 + $0x10] sm:$0xff] }
  0x16   : > { %2635 = vst [vmem:[#allocation6_spill] sm:$0xff] %v1734_v0  ;;  %s1748_s6 = sshll.u32 %s165_s25, 6  ;;  %p169_p10 = scmp.lt.s32.totalorder %s1298_s26, 3  ;;  %v1753_v3 = vld [vmem:[%s2596_s1 + $0x18] sm:$0xff]  ;;  %v1758_v4 = vld [vmem:[%s2596_s1 + $0x20] sm:$0x1] }
  0x17   : > { %2636 = vst [vmem:[#allocation7_spill] sm:$0xff] %v1739_v1  ;;  %s1760_s11 = sld [smem:[#allocation2]]  ;;  %s167_s21 = scalar_lea.vmem [#allocation3], %s1748_s6 }
  0x18   : > { %2637 = vst [vmem:[#allocation8_spill] sm:$0xff] %v1744_v2  ;;  %s2716_s26 = smov (!%p169_p10, %s1298_s26), 3  ;;  %s1768_s27 = smov 0  }
  0x19   : > { %2638 = vst [vmem:[#allocation9_spill] sm:$0xff] %v1753_v3  ;;  %s1397_s12 = smul.u32 48, %s2716_s26 }
  0x1a   : > { %2639 = vst [vmem:[#allocation10_spill] sm:$0xff] %v1758_v4 }
  0x1b   : > { %s1765_s20 = scalar_lea.vmem %s2595_s0, %s1397_s12 }
  0x1c LB: >> { %s1387_s28 = smul.u32 48, %s1654_s27  ;;  %vm213_vm0 = vcmask 1040384   ;;  %vm197_vm1 = vcmask 138240   ;;  %vm1082_vm2 = vcmask 1046528   ;;  %s1388_s26 = sshll.u32 %s1654_s27, 5  ;;  %s1654_s27 = sphi %s1768_s27, %s187_s27  }
  0x1d   : >> { %v2644_v0 = vld [vmem:[#allocation6_spill] sm:$0xff]  ;;  %s1200_s30 = scalar_lea.vmem %s167_s21, %s1388_s26 [#allocation3]  ;;  %s187_s27 = sadd.s32 1, %s1654_s27  }
  0x1e   : >> { %v2643_v1 = vld [vmem:[#allocation7_spill] sm:$0xff]  ;;  %s1775_s29 = scalar_lea.vmem %s1765_s20, %s1387_s28  ;;  %p184_p11 = scmp.ge.s32.totalorder %s187_s27, 2  }
  0x1f   : >> { %v2642_v2 = vld [vmem:[#allocation8_spill] sm:$0xff]  ;;  %v195_v5 = vld [vmem:[%s1775_s29 + $0x20] sm:$0x1]  ;;  %v196_v7 = vld [vmem:[%s1775_s29 + $0x28] sm:$0x1]  ;;  %s1390_s4 = sshll.u32 (%p184_p11), %s1702_s2, 6 }
  0x20   : >> { %v2641_v3 = vld [vmem:[#allocation9_spill] sm:$0xff]  ;;  %v193_v6 = vld [vmem:[%s1775_s29 + $0x10] sm:$0xff]  ;;  %1301 = vmatpush.msk.msra.mxu0 %vm213_vm0, %v195_v5  ;;  %1391 = vmatpush.msk.msra.mxu2 %vm213_vm0, %v195_v5  ;;  %v191_v9 = vld [vmem:[%s1775_s29] sm:$0xff]  ;;  %s1218_s8 = scalar_lea.hbm (%p184_p11), %s2598_s3, %s1390_s4  ;;  %s1219_s9 = sshll.u32 (%p184_p11), %s167_s21, 4  ;;  %s1220_s9 = int_to_ptr.vmem [resolvable:$true] %s1219_s9 }
  0x21   : >> { %v2640_v4 = vld [vmem:[#allocation10_spill] sm:$0xff]  ;;  %v194_v8 = vld [vmem:[%s1775_s29 + $0x18] sm:$0xff]  ;;  %1307 = vmatpush.msk.msra.mxu1 %vm213_vm0, %v196_v7  ;;  %1394 = vmatpush.msk.msra.mxu3 %vm213_vm0, %v196_v7  ;;  %v192_v10 = vld [vmem:[%s1775_s29 + $0x8] sm:$0xff]  ;;  %s1221_s10 = sshll.u32 (%p184_p11), %s1218_s8, 4  ;;  %s1206_s12 = scalar_lea.sflag (%p184_p11), [#allocation4], %s165_s25  ;;  %s1222_s10 = int_to_ptr.hbm [resolvable:$true] %s1221_s10 }
  0x22   : >> { %234 = vmatpush.msra.mxu0 %v193_v6  ;;  %1392 = vmatpush.msra.mxu2 %v193_v6  ;;  %s1598_s13 = sshra.s32 (%p184_p11), %s1222_s10, 4  ;;  %s1604_s20 = scalar_lea.hbm (%p184_p11), %s2598_s3, 128  ;;  %s1599_s13 = int_to_ptr.hbm [resolvable:$true] %s1598_s13 }
  0x23   : >> { %266 = vmatpush.msra.mxu1 %v194_v8  ;;  %1395 = vmatpush.msra.mxu3 %v194_v8  ;;  %s1600_s18 = scalar_lea.hbm (%p184_p11), %s1599_s13, 64  ;;  %p1605_p1 = scmp.lt.s32.totalorder (%p184_p11), %s1599_s13, %s2598_s3 }
  0x24   : >> { %235 = vmatpush.msra.mxu0 %v191_v9  ;;  %1393 = vmatpush.msra.mxu2 %v191_v9  ;;  %p1601_p12 = scmp.ne.s32.totalorder (%p184_p11), %s1599_s13, %s1600_s18  ;;  %p1606_p2 = scmp.lt.s32.totalorder (%p184_p11), %s1604_s20, %s1600_s18 }
  0x25   : >> { %1302 = vmatmul.msk.f32.vlgmr.msra.gmra.mxu0 %vm197_vm1, %v2644_v0  ;;  %267 = vmatpush.msra.mxu1 %v192_v10 }
  0x26   : >> { %1308 = vmatmul.msk.f32.vlgmr.msra.gmra.mxu1 %vm197_vm1, %v2644_v0  ;;  %1313 = vmatpush.msk.msrb.mxu0 %vm213_vm0, %v195_v5  ;;  %p1602_p13 = pnand (%p184_p11), %p1601_p12, %p1719_p5  ;;  %p1607_p3 = por (%p184_p11), %p1606_p2, %p1605_p1 }
  0x27   : >> { %1346 = vmatpush.msk.msrb.mxu1 %vm213_vm0, %v196_v7  ;;  %1396 = vmatpush.msra.mxu3 %v192_v10 }
  0x28   : >> { %458 = vmatpush.msrb.mxu0 %v193_v6  ;;  %p1603_p0 = pneg (%p184_p11), %p1602_p13 }
  0x29   : >> { %571 = vmatpush.msrb.mxu1 %v194_v8 }
  0x2a   : >> { %459 = vmatpush.msrb.mxu0 %v191_v9  ;;  %p1608_p4 = pnand (%p184_p11), %p1607_p3, %p1603_p0 }
  0x2b   : >> { %572 = vmatpush.msrb.mxu1 %v192_v10 }
  0x2d   : >> { %1303 = vmatmul.msk.f32.gmra.mxu0 %vm197_vm1, %v2643_v1 }
  0x2e   : >> { %1309 = vmatmul.msk.f32.gmra.mxu1 %vm197_vm1, %v2643_v1 }
  0x35   : >> { %1304 = vmatmul.msk.f32.gmra.mxu0 %vm197_vm1, %v2642_v2 }
  0x36   : >> { %1310 = vmatmul.msk.f32.gmra.mxu1 %vm197_vm1, %v2642_v2 }
  0x3d   : >> { %1305 = vmatmul.msk.f32.gmra.mxu0 %vm197_vm1, %v2641_v3 }
  0x3e   : >> { %1311 = vmatmul.msk.f32.gmra.mxu1 %vm197_vm1, %v2641_v3 }
  0x45   : >> { %1306 = vmatmul.msk.f32.gmra.mxu0 %vm197_vm1, %v2640_v4 }
  0x46   : >> { %1312 = vmatmul.msk.f32.gmra.mxu1 %vm197_vm1, %v2640_v4 }
  0xa2   : >> { %v237_v11 = vpop.f32.mrf.mxu0 }
  0xa3   : >> { %284 = vxpose.xlu0.b32.start [1/3] (short) %v237_v11, 128  ;;  %v269_v12 = vpop.f32.mrf.mxu1 }
  0xa4   : >> { %316 = vxpose.xlu1.b32.start [1/3] (short) %v269_v12, 128 }
  0xaa   : >> { %v240_v13 = vpop.f32.mrf.mxu0 }
  0xab   : >> { %285 = vxpose.xlu0.b32.cont [2/3] (short) %v240_v13, 128  ;;  %v272_v14 = vpop.f32.mrf.mxu1 }
  0xac   : >> { %317 = vxpose.xlu1.b32.cont [2/3] (short) %v272_v14, 128 }
  0xb2   : >> { %v1809_v15 = vpop.f32.mrf.mxu0 }
  0xb3   : >> { %2645 = vst [vmem:[#allocation11_spill] sm:$0xff] %v1809_v15  ;;  %286 = vxpose.xlu0.b32.end [3/3] (short) %v1809_v15, 128  ;;  %v1812_v16 = vpop.f32.mrf.mxu1 }
  0xb4   : >> { %2646 = vst [vmem:[#allocation12_spill] sm:$0xff] %v1812_v16  ;;  %318 = vxpose.xlu1.b32.end [3/3] (short) %v1812_v16, 128 }
  0xba   : >> { %v1897_v59 = vpop.f32.mrf.mxu0 }
  0xbb   : >> { %2649 = vst [vmem:[#allocation15_spill] sm:$0xff] %v1897_v59  ;;  %v1911_v6 = vpop.f32.mrf.mxu1 }
  0xbc   : >> { %2651 = vst [vmem:[#allocation17_spill] sm:$0xff] %v1911_v6 }
  0xc2   : >> { %v1905_v62 = vpop.f32.mrf.mxu0 }
  0xc3   : >> { %2650 = vst [vmem:[#allocation16_spill] sm:$0xff] %v1905_v62  ;;  %v1919_v10 = vpop.f32.mrf.mxu1 }
  0xc4   : >> { %2653 = vst [vmem:[#allocation19_spill] sm:$0xff] %v1919_v10 }
 0x147   : >> { %v300_v17 = vpop.trf.xlu0 }
 0x148   : >> { %1314 = vmatmul.msk.f32.vlgmr.msrb.gmra.mxu0 %vm197_vm1, %v300_v17  ;;  %1347 = vmatmul.msk.f32.vlgmr.msrb.gmra.mxu1 %vm197_vm1, %v300_v17  ;;  %v332_v29 = vpop.trf.xlu1 }
 0x14f   : >> { %v301_v18 = vpop.trf.xlu0 }
 0x150   : >> { %1315 = vmatmul.msk.f32.gmra.mxu0 %vm197_vm1, %v301_v18  ;;  %1348 = vmatmul.msk.f32.gmra.mxu1 %vm197_vm1, %v301_v18  ;;  %v333_v32 = vpop.trf.xlu1 }
 0x157   : >> { %v302_v19 = vpop.trf.xlu0 }
 0x158   : >> { %1316 = vmatmul.msk.f32.gmra.mxu0 %vm197_vm1, %v302_v19  ;;  %1349 = vmatmul.msk.f32.gmra.mxu1 %vm197_vm1, %v302_v19  ;;  %v334_v34 = vpop.trf.xlu1 }
 0x15f   : >> { %v303_v20 = vpop.trf.xlu0 }
 0x160   : >> { %1317 = vmatmul.msk.f32.gmra.mxu0 %vm197_vm1, %v303_v20  ;;  %1350 = vmatmul.msk.f32.gmra.mxu1 %vm197_vm1, %v303_v20  ;;  %v335_v36 = vpop.trf.xlu1 }
 0x167   : >> { %v304_v21 = vpop.trf.xlu0 }
 0x168   : >> { %1318 = vmatmul.msk.f32.gmra.mxu0 %vm197_vm1, %v304_v21  ;;  %1351 = vmatmul.msk.f32.gmra.mxu1 %vm197_vm1, %v304_v21  ;;  %v336_v37 = vpop.trf.xlu1 }
 0x16f   : >> { %v305_v22 = vpop.trf.xlu0 }
 0x170   : >> { %1319 = vmatmul.msk.f32.gmra.mxu0 %vm197_vm1, %v305_v22  ;;  %1352 = vmatmul.msk.f32.gmra.mxu1 %vm197_vm1, %v305_v22  ;;  %v337_v38 = vpop.trf.xlu1 }
 0x177   : >> { %v306_v23 = vpop.trf.xlu0 }
 0x178   : >> { %1320 = vmatmul.msk.f32.gmra.mxu0 %vm197_vm1, %v306_v23  ;;  %1353 = vmatmul.msk.f32.gmra.mxu1 %vm197_vm1, %v306_v23  ;;  %v338_v39 = vpop.trf.xlu1 }
 0x17f   : >> { %v307_v24 = vpop.trf.xlu0 }
 0x180   : >> { %1321 = vmatmul.msk.f32.gmra.mxu0 %vm197_vm1, %v307_v24  ;;  %1354 = vmatmul.msk.f32.gmra.mxu1 %vm197_vm1, %v307_v24  ;;  %v339_v40 = vpop.trf.xlu1 }
 0x187   : >> { %v308_v25 = vpop.trf.xlu0 }
 0x188   : >> { %1322 = vmatmul.msk.f32.gmra.mxu0 %vm197_vm1, %v308_v25  ;;  %1355 = vmatmul.msk.f32.gmra.mxu1 %vm197_vm1, %v308_v25  ;;  %v340_v41 = vpop.trf.xlu1 }
 0x18f   : >> { %v309_v26 = vpop.trf.xlu0 }
 0x190   : >> { %1323 = vmatmul.msk.f32.gmra.mxu0 %vm197_vm1, %v309_v26  ;;  %1356 = vmatmul.msk.f32.gmra.mxu1 %vm197_vm1, %v309_v26  ;;  %v341_v42 = vpop.trf.xlu1 }
 0x197   : >> { %v310_v27 = vpop.trf.xlu0 }
 0x198   : >> { %1324 = vmatmul.msk.f32.vlgmr.msra.gmra.mxu2 %vm197_vm1, %v310_v27  ;;  %1357 = vmatmul.msk.f32.vlgmr.msra.gmra.mxu3 %vm197_vm1, %v310_v27  ;;  %v342_v43 = vpop.trf.xlu1 }
 0x19f   : >> { %v311_v28 = vpop.trf.xlu0 }
 0x1a0   : >> { %1325 = vmatmul.msk.f32.gmra.mxu2 %vm197_vm1, %v311_v28  ;;  %1358 = vmatmul.msk.f32.gmra.mxu3 %vm197_vm1, %v311_v28  ;;  %v343_v44 = vpop.trf.xlu1 }
 0x1a7   : >> { %v312_v30 = vpop.trf.xlu0 }
 0x1a8   : >> { %1326 = vmatmul.msk.f32.gmra.mxu2 %vm197_vm1, %v312_v30  ;;  %1359 = vmatmul.msk.f32.gmra.mxu3 %vm197_vm1, %v312_v30  ;;  %v344_v47 = vpop.trf.xlu1 }
 0x1af   : >> { %v313_v31 = vpop.trf.xlu0 }
 0x1b0   : >> { %1327 = vmatmul.msk.f32.gmra.mxu2 %vm197_vm1, %v313_v31  ;;  %1360 = vmatmul.msk.f32.gmra.mxu3 %vm197_vm1, %v313_v31  ;;  %v345_v50 = vpop.trf.xlu1 }
 0x1b7   : >> { %v314_v33 = vpop.trf.xlu0 }
 0x1b8   : >> { %1328 = vmatmul.msk.f32.gmra.mxu2 %vm197_vm1, %v314_v33  ;;  %1361 = vmatmul.msk.f32.gmra.mxu3 %vm197_vm1, %v314_v33  ;;  %v346_v53 = vpop.trf.xlu1 }
 0x1bf   : >> { %v315_v35 = vpop.trf.xlu0 }
 0x1c0   : >> { %1329 = vmatmul.msk.f32.gmra.mxu2 %vm197_vm1, %v315_v35  ;;  %1362 = vmatmul.msk.f32.gmra.mxu3 %vm197_vm1, %v315_v35  ;;  %v347_v58 = vpop.trf.xlu1 }
 0x1c5   : >> { %v1913_v7 = vpop.f32.mrf.mxu0  ;;  %v1927_v14 = vpop.f32.mrf.mxu1 }
 0x1c8   : >> { %1330 = vmatmul.msk.f32.gmra.mxu2 %vm197_vm1, %v332_v29  ;;  %1363 = vmatmul.msk.f32.gmra.mxu3 %vm197_vm1, %v332_v29 }
 0x1cd   : >> { %v1921_v11 = vpop.f32.mrf.mxu0  ;;  %v1939_v22 = vpop.f32.mrf.mxu1 }
 0x1d0   : >> { %1331 = vmatmul.msk.f32.gmra.mxu2 %vm197_vm1, %v333_v32  ;;  %1364 = vmatmul.msk.f32.gmra.mxu3 %vm197_vm1, %v333_v32 }
 0x1d5   : >> { %v1933_v19 = vpop.f32.mrf.mxu0  ;;  %v1947_v26 = vpop.f32.mrf.mxu1 }
 0x1d8   : >> { %1332 = vmatmul.msk.f32.gmra.mxu2 %vm197_vm1, %v334_v34  ;;  %1365 = vmatmul.msk.f32.gmra.mxu3 %vm197_vm1, %v334_v34 }
 0x1dd   : >> { %v1941_v23 = vpop.f32.mrf.mxu0  ;;  %v1955_v30 = vpop.f32.mrf.mxu1 }
 0x1de   : >> { %2656 = vst [vmem:[#allocation22_spill] sm:$0xff] %v1941_v23 }
 0x1df   : >> { %2659 = vst [vmem:[#allocation25_spill] sm:$0xff] %v1955_v30 }
 0x1e0   : >> { %1333 = vmatmul.msk.f32.gmra.mxu2 %vm197_vm1, %v335_v36  ;;  %1366 = vmatmul.msk.f32.gmra.mxu3 %vm197_vm1, %v335_v36 }
 0x1e5   : >> { %v1949_v27 = vpop.f32.mrf.mxu0  ;;  %v1963_v34 = vpop.f32.mrf.mxu1 }
 0x1e6   : >> { %2658 = vst [vmem:[#allocation24_spill] sm:$0xff] %v1949_v27 }
 0x1e8   : >> { %1334 = vmatmul.msk.f32.gmra.mxu2 %vm197_vm1, %v336_v37  ;;  %1367 = vmatmul.msk.f32.gmra.mxu3 %vm197_vm1, %v336_v37 }
 0x1ed   : >> { %v1957_v31 = vpop.f32.mrf.mxu0 }
 0x1ee   : >> { %2660 = vst [vmem:[#allocation26_spill] sm:$0xff] %v1957_v31 }
 0x1f0   : >> { %1335 = vmatmul.msk.f32.gmra.mxu2 %vm197_vm1, %v337_v38  ;;  %1368 = vmatmul.msk.f32.gmra.mxu3 %vm197_vm1, %v337_v38 }
 0x1f5   : >> { %v1967_v36 = vpop.f32.mrf.mxu0 }
 0x1f8   : >> { %1336 = vmatmul.msk.f32.gmra.mxu2 %vm197_vm1, %v338_v39  ;;  %1369 = vmatmul.msk.f32.gmra.mxu3 %vm197_vm1, %v338_v39  ;;  %v1973_v39 = vpop.f32.mrf.mxu1 }
 0x200   : >> { %1337 = vmatmul.msk.f32.gmra.mxu2 %vm197_vm1, %v339_v40  ;;  %1370 = vmatmul.msk.f32.gmra.mxu3 %vm197_vm1, %v339_v40  ;;  %v1975_v40 = vpop.f32.mrf.mxu0 }
 0x201   : >> { %2663 = vst [vmem:[#allocation29_spill] sm:$0xff] %v1975_v40 }
 0x208   : >> { %1338 = vmatmul.msk.f32.gmra.mxu2 %vm197_vm1, %v340_v41  ;;  %1371 = vmatmul.msk.f32.gmra.mxu3 %vm197_vm1, %v340_v41 }
 0x210   : >> { %1339 = vmatmul.msk.f32.gmra.mxu2 %vm197_vm1, %v341_v42  ;;  %1372 = vmatmul.msk.f32.gmra.mxu3 %vm197_vm1, %v341_v42 }
 0x218   : >> { %1340 = vmatmul.msk.f32.gmra.mxu2 %vm197_vm1, %v342_v43  ;;  %1373 = vmatmul.msk.f32.gmra.mxu3 %vm197_vm1, %v342_v43  ;;  %v1981_v43 = vpop.f32.mrf.mxu1 }
 0x21b   : >> { %v1869_v45 = vpop.f32.mrf.mxu2  ;;  %v1871_v46 = vpop.f32.mrf.mxu3 }
 0x220   : >> { %1341 = vmatmul.msk.f32.gmra.mxu2 %vm197_vm1, %v343_v44  ;;  %1374 = vmatmul.msk.f32.gmra.mxu3 %vm197_vm1, %v343_v44  ;;  %v1983_v44 = vpop.f32.mrf.mxu0  ;;  %v1993_v0 = vpop.f32.mrf.mxu1 }
 0x223   : >> { %v1875_v48 = vpop.f32.mrf.mxu2  ;;  %v1877_v49 = vpop.f32.mrf.mxu3 }
 0x228   : >> { %1342 = vmatmul.msk.f32.gmra.mxu2 %vm197_vm1, %v344_v47  ;;  %1375 = vmatmul.msk.f32.gmra.mxu3 %vm197_vm1, %v344_v47  ;;  %v1997_v3 = vpop.f32.mrf.mxu0 }
 0x22b   : >> { %v1881_v51 = vpop.f32.mrf.mxu2  ;;  %v1883_v52 = vpop.f32.mrf.mxu3 }
 0x230   : >> { %1343 = vmatmul.msk.f32.gmra.mxu2 %vm197_vm1, %v345_v50  ;;  %1376 = vmatmul.msk.f32.gmra.mxu3 %vm197_vm1, %v345_v50 }
 0x233   : >> { %v1887_v54 = vpop.f32.mrf.mxu2  ;;  %v1889_v55 = vpop.f32.mrf.mxu3 }
 0x234   : >> { %2647 = vst [vmem:[#allocation13_spill] sm:$0xff] %v1887_v54 }
 0x235   : >> { %2648 = vst [vmem:[#allocation14_spill] sm:$0xff] %v1889_v55 }
 0x238   : >> { %1344 = vmatmul.msk.f32.gmra.mxu2 %vm197_vm1, %v346_v53  ;;  %1377 = vmatmul.msk.f32.gmra.mxu3 %vm197_vm1, %v346_v53  ;;  %v670_v53 = vmax.f32 %v1913_v7, %v1933_v19 }
 0x23a   : >> { %v672_v1 = vmax.f32 %v670_v53, %v1949_v27  ;;  %v2011_v27 = vpop.f32.mrf.mxu1 }
 0x23b   : >> { %v1893_v56 = vpop.f32.mrf.mxu2  ;;  %v1895_v57 = vpop.f32.mrf.mxu3 }
 0x23c   : >> { %v674_v62 = vmax.f32 %v672_v1, %v1967_v36 }
 0x23e   : >> { %v676_v6 = vmax.f32 %v674_v62, %v1983_v44 }
 0x240   : >> { %1345 = vmatmul.msk.f32.gmra.mxu2 %vm197_vm1, %v347_v58  ;;  %1378 = vmatmul.msk.f32.gmra.mxu3 %vm197_vm1, %v347_v58  ;;  %v671_v58 = vmax.f32 %v1921_v11, %v1941_v23  ;;  %v678_v59 = vmax.f32 %v676_v6, %v1869_v45  ;;  %v708_v6 = vmax.f32 %v1939_v22, %v1955_v30 }
 0x242   : >> { %v673_v2 = vmax.f32 %v671_v58, %v1957_v31  ;;  %v680_v58 = vmax.f32 %v678_v59, %v1881_v51 }
 0x243   : >> { %v1901_v60 = vpop.f32.mrf.mxu2  ;;  %v1903_v61 = vpop.f32.mrf.mxu3 }
 0x244   : >> { %v675_v15 = vmax.f32 %v673_v2, %v1975_v40  ;;  %v682_v1 = vmax.f32 %v680_v58, %v1893_v56 }
 0x246   : >> { %v677_v16 = vmax.f32 %v675_v15, %v1997_v3 }
 0x248   : >> { %v679_v53 = vmax.f32 %v677_v16, %v1875_v48 }
 0x24a   : >> { %v681_v31 = vmax.f32 %v679_v53, %v1887_v54 }
 0x24b   : >> { %v1907_v63 = vpop.f32.mrf.mxu2  ;;  %v1909_v5 = vpop.f32.mrf.mxu3 }
 0x24c   : >> { %v683_v2 = vmax.f32 %v681_v31, %v1901_v60  ;;  %v684_v15 = vmax.f32 %v682_v1, %v1907_v63  ;;  %v707_v31 = vmax.f32 %v1927_v14, %v1947_v26  ;;  %v710_v1 = vmax.f32 %v708_v6, %v1973_v39 }
 0x24e   : >> { %v712_v30 = vmax.f32 %v710_v1, %v1993_v0 }
 0x253   : >> { %v1915_v8 = vpop.f32.mrf.mxu2  ;;  %v1917_v9 = vpop.f32.mrf.mxu3 }
 0x254   : >> { %2652 = vst [vmem:[#allocation18_spill] sm:$0xff] %v1917_v9  ;;  %v685_v62 = vmax.f32 %v683_v2, %v1915_v8 }
 0x25b   : >> { %v1923_v12 = vpop.f32.mrf.mxu2  ;;  %v1925_v13 = vpop.f32.mrf.mxu3 }
 0x25c   : >> { %2654 = vst [vmem:[#allocation20_spill] sm:$0xff] %v1923_v12  ;;  %v686_v16 = vmax.f32 %v684_v15, %v1923_v12  ;;  %v2034_v12 = vpop.f32.mrf.mxu1 }
 0x25d   : >> { %v714_v6 = vmax.f32 %v712_v30, %v2034_v12 }
 0x263   : >> { %v1929_v17 = vpop.f32.mrf.mxu2  ;;  %v1931_v18 = vpop.f32.mrf.mxu3 }
 0x264   : >> { %v687_v59 = vmax.f32 %v685_v62, %v1929_v17  ;;  %v709_v62 = vmax.f32 %v707_v31, %v1963_v34  ;;  %v716_v31 = vmax.f32 %v714_v6, %v1877_v49 }
 0x26b   : >> { %v1935_v20 = vpop.f32.mrf.mxu2  ;;  %v1937_v21 = vpop.f32.mrf.mxu3 }
 0x26c   : >> { %2655 = vst [vmem:[#allocation21_spill] sm:$0xff] %v1935_v20  ;;  %v688_v53 = vmax.f32 %v686_v16, %v1935_v20  ;;  %v711_v20 = vmax.f32 %v709_v62, %v1981_v43  ;;  %v718_v62 = vmax.f32 %v716_v31, %v1889_v55 }
 0x273   : >> { %v1943_v24 = vpop.f32.mrf.mxu2  ;;  %v1945_v25 = vpop.f32.mrf.mxu3 }
 0x274   : >> { %2657 = vst [vmem:[#allocation23_spill] sm:$0xff] %v1943_v24  ;;  %v689_v54 = vmax.f32 %v687_v59, %v1943_v24 }
 0x27b   : >> { %v1951_v28 = vpop.f32.mrf.mxu2  ;;  %v1953_v29 = vpop.f32.mrf.mxu3 }
 0x27c   : >> { %v690_v2 = vmax.f32 %v688_v53, %v1951_v28 }
 0x283   : >> { %v1959_v32 = vpop.f32.mrf.mxu2  ;;  %v1961_v33 = vpop.f32.mrf.mxu3 }
 0x284   : >> { %2661 = vst [vmem:[#allocation27_spill] sm:$0xff] %v1959_v32  ;;  %v691_v15 = vmax.f32 %v689_v54, %v1959_v32  ;;  %v713_v32 = vmax.f32 %v711_v20, %v2011_v27  ;;  %v720_v20 = vmax.f32 %v718_v62, %v1903_v61 }
 0x28b   : >> { %v1965_v35 = vpop.f32.mrf.mxu2  ;;  %v1969_v37 = vpop.f32.mrf.mxu3 }
 0x28c   : >> { %2662 = vst [vmem:[#allocation28_spill] sm:$0xff] %v1965_v35  ;;  %v692_v16 = vmax.f32 %v690_v2, %v1965_v35 }
 0x293   : >> { %v1971_v38 = vpop.f32.mrf.mxu2  ;;  %v1977_v41 = vpop.f32.mrf.mxu3 }
 0x294   : >> { %v693_v59 = vmax.f32 %v691_v15, %v1971_v38  ;;  %v715_v15 = vmax.f32 %v713_v32, %v1871_v46 }
 0x29b   : >> { %v1979_v42 = vpop.f32.mrf.mxu2  ;;  %v1985_v47 = vpop.f32.mrf.mxu3 }
 0x29c   : >> { %v694_v53 = vmax.f32 %v692_v16, %v1979_v42 }
 0x2a3   : >> { %v1987_v50 = vpop.f32.mrf.mxu2  ;;  %v1999_v4 = vpop.f32.mrf.mxu3 }
 0x2a4   : >> { %2664 = vst [vmem:[#allocation30_spill] sm:$0xff] %v1987_v50  ;;  %v695_v54 = vmax.f32 %v693_v59, %v1987_v50  ;;  %v717_v59 = vmax.f32 %v715_v15, %v1883_v52 }
 0x2a6   : >> { %v719_v6 = vmax.f32 %v717_v59, %v1895_v57 }
 0x2a8   : >> { %v721_v32 = vmax.f32 %v719_v6, %v1909_v5 }
 0x2ab   : >> { %v2001_v10 = vpop.f32.mrf.mxu2  ;;  %v2017_v40 = vpop.f32.mrf.mxu3 }
 0x2ac   : >> { %v696_v1 = vmax.f32 %v694_v53, %v2001_v10  ;;  %v722_v53 = vmax.f32 %v720_v20, %v1917_v9 }
 0x2ae   : >> { %v724_v31 = vmax.f32 %v722_v53, %v1931_v18 }
 0x2b3   : >> { %v2013_v23 = vpop.f32.mrf.mxu2  ;;  %v2040_v24 = vpop.f32.mrf.mxu3 }
 0x2b4   : >> { %2665 = vst [vmem:[#allocation31_spill] sm:$0xff] %v2013_v23  ;;  %v697_v2 = vmax.f32 %v695_v54, %v2013_v23 }
 0x2bb   : >> { %v2027_v58 = vpop.f32.mrf.mxu2  ;;  %v2060_v23 = vpop.f32.mrf.mxu3 }
 0x2bc   : >> { %v698_v30 = vmax.f32 %v696_v1, %v2027_v58  ;;  %v723_v1 = vmax.f32 %v721_v32, %v1925_v13 }
 0x2be   : >> { %v725_v62 = vmax.f32 %v723_v1, %v1937_v21 }
 0x2c0   : >> { %v727_v59 = vmax.f32 %v725_v62, %v1953_v29 }
 0x2c2   : >> { %v729_v6 = vmax.f32 %v727_v59, %v1969_v37 }
 0x2c3   : >> { %v2050_v35 = vpop.f32.mrf.mxu2 }
 0x2c4   : >> { %v699_v16 = vmax.f32 %v697_v2, %v2050_v35  ;;  %v726_v2 = vmax.f32 %v724_v31, %v1945_v25 }
 0x2c6   : >> { %v700_v50 = vmax.f32 %v698_v30, %v699_v16  ;;  %v728_v30 = vmax.f32 %v726_v2, %v1961_v33 }
 0x2c8   : >> { %v701_v54 = vrot.slane %v700_v50, 4  ;;  %v730_v20 = vmax.f32 %v728_v30, %v1977_v41 }
 0x2ca   : >> { %v702_v55 = vmax.f32 %v700_v50, %v701_v54  ;;  %v732_v53 = vmax.f32 %v730_v20, %v1999_v4  ;;  %v2072_v50 = vpop.f32.mrf.mxu3  ;;  %v731_v54 = vmax.f32 %v729_v6, %v1985_v47  ;;  %v2667_v20 = vld [vmem:[#allocation22_spill] sm:$0xff] }
 0x2cb   : >> { %2666 = vst [vmem:[#allocation32_spill] sm:$0xff] %v2072_v50 }
 0x2cc   : >> { %v703_v15 = vrot.slane %v702_v55, 2  ;;  %v734_v32 = vmax.f32 %v732_v53, %v2040_v24  ;;  %v733_v1 = vmax.f32 %v731_v54, %v2017_v40  ;;  %v2668_v53 = vld [vmem:[#allocation24_spill] sm:$0xff] }
 0x2ce   : >> { %v704_v16 = vmax.f32 %v702_v55, %v703_v15  ;;  %v736_v55 = vmax.f32 %v734_v32, %v2072_v50  ;;  %v735_v2 = vmax.f32 %v733_v1, %v2060_v23 }
 0x2d0   : >> { %v705_v9 = vrot.slane %v704_v16, 1  ;;  %v737_v59 = vmax.f32 %v735_v2, %v736_v55 }
 0x2d2   : >> { %v2076_v31 = vmax.f32 %v704_v16, %v705_v9  ;;  %v738_v1 = vrot.slane %v737_v59, 4 }
 0x2d4   : >> { %v744_v15 = vsub.f32 %v1913_v7, %v2076_v31  ;;  %v746_v62 = vsub.f32 %v1921_v11, %v2076_v31  ;;  %v748_v30 = vsub.f32 %v1933_v19, %v2076_v31  ;;  %v750_v9 = vsub.f32 %v2667_v20, %v2076_v31  ;;  %v2669_v7 = vld [vmem:[#allocation26_spill] sm:$0xff] }
 0x2d5   : >> { %v752_v54 = vsub.f32 %v2668_v53, %v2076_v31  ;;  %v754_v50 = vsub.f32 %v2669_v7, %v2076_v31  ;;  %v756_v19 = vsub.f32 %v1967_v36, %v2076_v31  ;;  %v739_v2 = vmax.f32 %v737_v59, %v738_v1 }
 0x2d6   : >> { %v808_v16 = vmul.f32 1.442695, %v744_v15  ;;  %v812_v6 = vmul.f32 1.442695, %v746_v62  ;;  %v816_v32 = vmul.f32 1.442695, %v748_v30  ;;  %v762_v59 = vsub.f32 %v1997_v3, %v2076_v31 }
 0x2d7   : >> { %v820_v11 = vmul.f32 1.442695, %v750_v9  ;;  %v824_v55 = vmul.f32 1.442695, %v752_v54  ;;  %v2670_v15 = vld [vmem:[#allocation29_spill] sm:$0xff] }
 0x2d8   : >> { %1448 = vpow2.f32 %v808_v16  ;;  %v758_v62 = vsub.f32 %v2670_v15, %v2076_v31  ;;  %v828_v20 = vmul.f32 1.442695, %v754_v50  ;;  %v760_v16 = vsub.f32 %v1983_v44, %v2076_v31 }
 0x2d9   : >> { %1450 = vpow2.f32 %v812_v6  ;;  %v832_v9 = vmul.f32 1.442695, %v756_v19  ;;  %v740_v6 = vrot.slane %v739_v2, 2  ;;  %v764_v44 = vsub.f32 %v1869_v45, %v2076_v31 }
 0x2da   : >> { %1452 = vpow2.f32 %v816_v32  ;;  %v836_v50 = vmul.f32 1.442695, %v758_v62  ;;  %v840_v7 = vmul.f32 1.442695, %v760_v16  ;;  %v766_v15 = vsub.f32 %v1875_v48, %v2076_v31 }
 0x2db   : >> { %1454 = vpow2.f32 %v820_v11  ;;  %v741_v19 = vmax.f32 %v739_v2, %v740_v6  ;;  %v844_v3 = vmul.f32 1.442695, %v762_v59  ;;  %v848_v45 = vmul.f32 1.442695, %v764_v44  ;;  %v2674_v6 = vld [vmem:[#allocation13_spill] sm:$0xff] }
 0x2dc   : >> { %1456 = vpow2.f32 %v824_v55  ;;  %v852_v48 = vmul.f32 1.442695, %v766_v15 }
 0x2dd   : >> { %1458 = vpow2.f32 %v828_v20 }
 0x2de   : >> { %v2097_v53 = vpop.eup %1448  ;;  %1460 = vpow2.f32 %v832_v9  ;;  %v742_v9 = vrot.slane %v741_v19, 1 }
 0x2df   : >> { %2671 = vst [vmem:[#allocation22_spill] sm:$0xff] %v2097_v53  ;;  %v2099_v30 = vpop.eup %1450  ;;  %1462 = vpow2.f32 %v836_v50 }
 0x2e0   : >> { %2672 = vst [vmem:[#allocation24_spill] sm:$0xff] %v2099_v30  ;;  %v936_v36 = vadd.f32 %v2099_v30, %v2097_v53  ;;  %v2105_v54 = vpop.eup %1452  ;;  %1464 = vpow2.f32 %v840_v7  ;;  %v2135_v7 = vmax.f32 %v741_v19, %v742_v9 }
 0x2e1   : >> { %2673 = vst [vmem:[#allocation26_spill] sm:$0xff] %v2105_v54  ;;  %v2110_v1 = vpop.eup %1454  ;;  %1466 = vpow2.f32 %v844_v3  ;;  %v776_v3 = vsub.f32 %v1907_v63, %v2076_v31 }
 0x2e2   : >> { %v937_v32 = vadd.f32 %v2105_v54, %v936_v36  ;;  %v2115_v55 = vpop.eup %1456  ;;  %v768_v36 = vsub.f32 %v1881_v51, %v2076_v31  ;;  %1468 = vpow2.f32 %v848_v45  ;;  %v745_v45 = vsub.f32 %v1927_v14, %v2135_v7 }
 0x2e3   : >> { %v2120_v20 = vpop.eup %1458  ;;  %1470 = vpow2.f32 %v852_v48  ;;  %v747_v63 = vsub.f32 %v1939_v22, %v2135_v7  ;;  %v749_v14 = vsub.f32 %v1947_v26, %v2135_v7 }
 0x2e4   : >> { %v938_v11 = vadd.f32 %v2110_v1, %v937_v32  ;;  %v2125_v2 = vpop.eup %1460  ;;  %v770_v32 = vsub.f32 %v2674_v6, %v2076_v31  ;;  %v856_v51 = vmul.f32 1.442695, %v768_v36  ;;  %v774_v6 = vsub.f32 %v1901_v60, %v2076_v31 }
 0x2e5   : >> { %v2130_v50 = vpop.eup %1462 }
 0x2e6   : >> { %v939_v62 = vadd.f32 %v2115_v55, %v938_v11  ;;  %v772_v11 = vsub.f32 %v1893_v56, %v2076_v31  ;;  %v860_v15 = vmul.f32 1.442695, %v770_v32  ;;  %v778_v56 = vsub.f32 %v1915_v8, %v2076_v31  ;;  %v2675_v32 = vld [vmem:[#allocation20_spill] sm:$0xff] }
 0x2e7   : >> { %1472 = vpow2.f32 %v856_v51  ;;  %v868_v9 = vmul.f32 1.442695, %v774_v6  ;;  %v780_v48 = vsub.f32 %v2675_v32, %v2076_v31  ;;  %v2677_v32 = vld [vmem:[#allocation21_spill] sm:$0xff] }
 0x2e8   : >> { %v940_v16 = vadd.f32 %v2120_v20, %v939_v62  ;;  %v2137_v62 = vpop.eup %1464  ;;  %v864_v19 = vmul.f32 1.442695, %v772_v11  ;;  %1474 = vpow2.f32 %v860_v15  ;;  %v876_v11 = vmul.f32 1.442695, %v778_v56 }
 0x2e9   : >> { %v2144_v53 = vpop.eup %1466  ;;  %v810_v15 = vmul.f32 1.442695, %v745_v45  ;;  %v880_v56 = vmul.f32 1.442695, %v780_v48  ;;  %v818_v45 = vmul.f32 1.442695, %v749_v14  ;;  %v755_v48 = vsub.f32 %v1973_v39, %v2135_v7 }
 0x2ea   : >> { %v941_v59 = vadd.f32 %v2125_v2, %v940_v16  ;;  %v2151_v60 = vpop.eup %1468  ;;  %1476 = vpow2.f32 %v864_v19  ;;  %v784_v19 = vsub.f32 %v2677_v32, %v2076_v31  ;;  %v2679_v39 = vld [vmem:[#allocation27_spill] sm:$0xff] }
 0x2eb   : >> { %v2158_v51 = vpop.eup %1470  ;;  %1478 = vpow2.f32 %v868_v9  ;;  %v2678_v9 = vld [vmem:[#allocation23_spill] sm:$0xff] }
 0x2ec   : >> { %v942_v44 = vadd.f32 %v2130_v50, %v941_v59  ;;  %v872_v59 = vmul.f32 1.442695, %v776_v3  ;;  %v2676_v3 = vld [vmem:[#allocation25_spill] sm:$0xff] }
 0x2ed   : >> { %v2165_v22 = vpop.eup %1472 }
 0x2ee   : >> { %v943_v16 = vadd.f32 %v2137_v62, %v942_v44  ;;  %v782_v44 = vsub.f32 %v1929_v17, %v2076_v31  ;;  %1480 = vpow2.f32 %v872_v59  ;;  %v2172_v30 = vpop.eup %1474  ;;  %v753_v17 = vsub.f32 %v1963_v34, %v2135_v7 }
 0x2ef   : >> { %1482 = vpow2.f32 %v876_v11  ;;  %v788_v11 = vsub.f32 %v1951_v28, %v2076_v31  ;;  %v888_v34 = vmul.f32 1.442695, %v784_v19  ;;  %v759_v19 = vsub.f32 %v1993_v0, %v2135_v7 }
 0x2f0   : >> { %v944_v36 = vadd.f32 %v2144_v53, %v943_v16  ;;  %v751_v16 = vsub.f32 %v2676_v3, %v2135_v7  ;;  %v884_v54 = vmul.f32 1.442695, %v782_v44  ;;  %1484 = vpow2.f32 %v810_v15  ;;  %v2179_v3 = vpop.eup %1476 }
 0x2f1   : >> { %v757_v44 = vsub.f32 %v1981_v43, %v2135_v7  ;;  %v826_v15 = vmul.f32 1.442695, %v753_v17  ;;  %v2681_v43 = vld [vmem:[#allocation28_spill] sm:$0xff] }
 0x2f2   : >> { %v945_v8 = vadd.f32 %v2151_v60, %v944_v36  ;;  %v814_v36 = vmul.f32 1.442695, %v747_v63  ;;  %v822_v59 = vmul.f32 1.442695, %v751_v16  ;;  %v792_v17 = vsub.f32 %v2681_v43, %v2076_v31 }
 0x2f3   : >> { %v834_v0 = vmul.f32 1.442695, %v757_v44 }
 0x2f4   : >> { %v946_v6 = vadd.f32 %v2158_v51, %v945_v8  ;;  %v786_v8 = vsub.f32 %v2678_v9, %v2076_v31  ;;  %1486 = vpow2.f32 %v814_v36  ;;  %v790_v36 = vsub.f32 %v2679_v39, %v2076_v31 }
 0x2f5   : >> { %1488 = vpow2.f32 %v880_v56 }
 0x2f6   : >> { %v947_v26 = vadd.f32 %v2165_v22, %v946_v6  ;;  %v2186_v6 = vpop.eup %1478  ;;  %1490 = vpow2.f32 %v818_v45  ;;  %v892_v16 = vmul.f32 1.442695, %v786_v8  ;;  %v896_v45 = vmul.f32 1.442695, %v788_v11 }
 0x2f7   : >> { %v2190_v32 = vpop.eup %1480  ;;  %1492 = vpow2.f32 %v884_v54  ;;  %v794_v8 = vsub.f32 %v1971_v38, %v2076_v31  ;;  %v763_v38 = vsub.f32 %v2034_v12, %v2135_v7 }
 0x2f8   : >> { %v948_v63 = vadd.f32 %v2172_v30, %v947_v26  ;;  %v2195_v56 = vpop.eup %1482  ;;  %1494 = vpow2.f32 %v822_v59  ;;  %v830_v26 = vmul.f32 1.442695, %v755_v48  ;;  %v900_v59 = vmul.f32 1.442695, %v790_v36 }
 0x2f9   : >> { %v2199_v9 = vpop.eup %1484  ;;  %1496 = vpow2.f32 %v888_v34 }
 0x2fa   : >> { %v949_v14 = vadd.f32 %v2179_v3, %v948_v63  ;;  %2680 = vst [vmem:[#allocation29_spill] sm:$0xff] %v2199_v9  ;;  %v2204_v54 = vpop.eup %1486  ;;  %1498 = vpow2.f32 %v826_v15  ;;  %v904_v15 = vmul.f32 1.442695, %v792_v17 }
 0x2fb   : >> { %2682 = vst [vmem:[#allocation13_spill] sm:$0xff] %v2204_v54  ;;  %v2210_v48 = vpop.eup %1488  ;;  %1500 = vpow2.f32 %v892_v16  ;;  %v973_v11 = vadd.f32 %v2204_v54, %v2199_v9 }
 0x2fc   : >> { %v950_v28 = vadd.f32 %v2186_v6, %v949_v14  ;;  %v761_v14 = vsub.f32 %v2011_v27, %v2135_v7  ;;  %v2215_v34 = vpop.eup %1490  ;;  %1502 = vpow2.f32 %v830_v26  ;;  %v838_v27 = vmul.f32 1.442695, %v759_v19 }
 0x2fd   : >> { %2683 = vst [vmem:[#allocation20_spill] sm:$0xff] %v2215_v34  ;;  %v2221_v44 = vpop.eup %1492  ;;  %1504 = vpow2.f32 %v896_v45  ;;  %v974_v16 = vadd.f32 %v2215_v34, %v973_v11  ;;  %v908_v19 = vmul.f32 1.442695, %v794_v8  ;;  %v800_v11 = vsub.f32 %v2001_v10, %v2076_v31 }
 0x2fe   : >> { %v951_v63 = vadd.f32 %v2190_v32, %v950_v28  ;;  %v796_v28 = vsub.f32 %v1979_v42, %v2076_v31  ;;  %v2225_v43 = vpop.eup %1494  ;;  %v765_v42 = vsub.f32 %v1871_v46, %v2135_v7  ;;  %1506 = vpow2.f32 %v834_v0 }
 0x2ff   : >> { %2684 = vst [vmem:[#allocation25_spill] sm:$0xff] %v2225_v43  ;;  %v842_v12 = vmul.f32 1.442695, %v761_v14  ;;  %v2231_v26 = vpop.eup %1496  ;;  %1508 = vpow2.f32 %v900_v59  ;;  %v975_v45 = vadd.f32 %v2225_v43, %v974_v16  ;;  %v846_v46 = vmul.f32 1.442695, %v763_v38  ;;  %v2688_v16 = vld [vmem:[#allocation31_spill] sm:$0xff] }
 0x300   : >> { %v952_v39 = vadd.f32 %v2195_v56, %v951_v63  ;;  %v2685_v63 = vld [vmem:[#allocation30_spill] sm:$0xff]  ;;  %1510 = vpow2.f32 %v838_v27  ;;  %v912_v14 = vmul.f32 1.442695, %v796_v28  ;;  %v802_v54 = vsub.f32 %v2688_v16, %v2076_v31 }
 0x301   : >> { %v798_v9 = vsub.f32 %v2685_v63, %v2076_v31  ;;  %v767_v63 = vsub.f32 %v1877_v49, %v2135_v7  ;;  %1512 = vpow2.f32 %v904_v15  ;;  %v769_v10 = vsub.f32 %v1883_v52, %v2135_v7  ;;  %v2690_v16 = vld [vmem:[#allocation14_spill] sm:$0xff] }
 0x302   : >> { %v953_v36 = vadd.f32 %v2210_v48, %v952_v39  ;;  %v2235_v39 = vpop.eup %1498  ;;  %1514 = vpow2.f32 %v842_v12  ;;  %v850_v49 = vmul.f32 1.442695, %v765_v42  ;;  %v771_v34 = vsub.f32 %v2690_v16, %v2135_v7 }
 0x303   : >> { %2686 = vst [vmem:[#allocation21_spill] sm:$0xff] %v2235_v39  ;;  %v2241_v0 = vpop.eup %1500  ;;  %v976_v59 = vadd.f32 %v2235_v39, %v975_v45  ;;  %1516 = vpow2.f32 %v908_v19  ;;  %v916_v38 = vmul.f32 1.442695, %v798_v9  ;;  %v804_v45 = vsub.f32 %v2027_v58, %v2076_v31 }
 0x304   : >> { %v954_v17 = vadd.f32 %v2221_v44, %v953_v36  ;;  %v2245_v36 = vpop.eup %1502  ;;  %1518 = vpow2.f32 %v846_v46  ;;  %v854_v52 = vmul.f32 1.442695, %v767_v63  ;;  %v920_v42 = vmul.f32 1.442695, %v800_v11 }
 0x305   : >> { %2687 = vst [vmem:[#allocation23_spill] sm:$0xff] %v2245_v36  ;;  %v2251_v27 = vpop.eup %1504  ;;  %v977_v15 = vadd.f32 %v2245_v36, %v976_v59  ;;  %1520 = vpow2.f32 %v912_v14  ;;  %v806_v59 = vsub.f32 %v2050_v35, %v2076_v31  ;;  %v773_v58 = vsub.f32 %v1895_v57, %v2135_v7 }
 0x306   : >> { %v955_v8 = vadd.f32 %v2231_v26, %v954_v17  ;;  %v2255_v17 = vpop.eup %1506  ;;  %1522 = vpow2.f32 %v850_v49  ;;  %v858_v16 = vmul.f32 1.442695, %v769_v10  ;;  %v924_v63 = vmul.f32 1.442695, %v802_v54 }
 0x307   : >> { %2689 = vst [vmem:[#allocation27_spill] sm:$0xff] %v2255_v17  ;;  %v2261_v12 = vpop.eup %1508  ;;  %v978_v19 = vadd.f32 %v2255_v17, %v977_v15  ;;  %1524 = vpow2.f32 %v916_v38  ;;  %v775_v15 = vsub.f32 %v1903_v61, %v2135_v7  ;;  %v862_v35 = vmul.f32 1.442695, %v771_v34 }
 0x308   : >> { %v956_v28 = vadd.f32 %v2241_v0, %v955_v8  ;;  %v2265_v8 = vpop.eup %1510  ;;  %1526 = vpow2.f32 %v854_v52  ;;  %v928_v57 = vmul.f32 1.442695, %v804_v45  ;;  %v777_v38 = vsub.f32 %v1909_v5, %v2135_v7 }
 0x309   : >> { %2691 = vst [vmem:[#allocation28_spill] sm:$0xff] %v2265_v8  ;;  %v2271_v46 = vpop.eup %1512  ;;  %v979_v14 = vadd.f32 %v2265_v8, %v978_v19  ;;  %1528 = vpow2.f32 %v920_v42  ;;  %v932_v61 = vmul.f32 1.442695, %v806_v59  ;;  %v2692_v42 = vld [vmem:[#allocation18_spill] sm:$0xff]  ;;  %v781_v59 = vsub.f32 %v1925_v13, %v2135_v7 }
 0x30a   : >> { %v957_v9 = vadd.f32 %v2251_v27, %v956_v28  ;;  %v2275_v28 = vpop.eup %1514  ;;  %1530 = vpow2.f32 %v858_v16 }
 0x30b   : >> { %v2279_v31 = vpop.eup %1516  ;;  %v980_v49 = vadd.f32 %v2275_v28, %v979_v14  ;;  %1532 = vpow2.f32 %v924_v63  ;;  %v870_v14 = vmul.f32 1.442695, %v775_v15  ;;  %v874_v63 = vmul.f32 1.442695, %v777_v38 }
 0x30c   : >> { %v958_v11 = vadd.f32 %v2261_v12, %v957_v9  ;;  %v2283_v54 = vpop.eup %1518  ;;  %v866_v9 = vmul.f32 1.442695, %v773_v58  ;;  %1534 = vpow2.f32 %v862_v35 }
 0x30d   : >> { %v2287_v19 = vpop.eup %1520  ;;  %v981_v52 = vadd.f32 %v2283_v54, %v980_v49  ;;  %1536 = vpow2.f32 %v928_v57  ;;  %v783_v57 = vsub.f32 %v1931_v18, %v2135_v7 }
 0x30e   : >> { %v959_v10 = vadd.f32 %v2271_v46, %v958_v11  ;;  %v2291_v45 = vpop.eup %1522  ;;  %v779_v11 = vsub.f32 %v2692_v42, %v2135_v7  ;;  %1538 = vpow2.f32 %v866_v9  ;;  %v882_v42 = vmul.f32 1.442695, %v781_v59 }
 0x30f   : >> { %v2295_v43 = vpop.eup %1524  ;;  %v982_v58 = vadd.f32 %v2291_v45, %v981_v52  ;;  %1540 = vpow2.f32 %v932_v61  ;;  %v785_v61 = vsub.f32 %v1937_v21, %v2135_v7 }
 0x310   : >> { %v960_v34 = vadd.f32 %v2279_v31, %v959_v10  ;;  %v2299_v16 = vpop.eup %1526  ;;  %1542 = vpow2.f32 %v870_v14  ;;  %v787_v14 = vsub.f32 %v1945_v25, %v2135_v7 }
 0x311   : >> { %v2303_v10 = vpop.eup %1528  ;;  %v983_v15 = vadd.f32 %v2299_v16, %v982_v58  ;;  %1544 = vpow2.f32 %v874_v63  ;;  %v789_v63 = vsub.f32 %v1953_v29, %v2135_v7  ;;  %v793_v29 = vsub.f32 %v1969_v37, %v2135_v7 }
 0x312   : >> { %v961_v5 = vadd.f32 %v2287_v19, %v960_v34  ;;  %v2307_v49 = vpop.eup %1530  ;;  %v878_v34 = vmul.f32 1.442695, %v779_v11  ;;  %v797_v37 = vsub.f32 %v1985_v47, %v2135_v7  ;;  %v801_v47 = vsub.f32 %v2017_v40, %v2135_v7 }
 0x313   : >> { %v2311_v52 = vpop.eup %1532  ;;  %v984_v38 = vadd.f32 %v2307_v49, %v983_v15  ;;  %v805_v40 = vsub.f32 %v2060_v23, %v2135_v7 }
 0x314   : >> { %v962_v35 = vadd.f32 %v2295_v43, %v961_v5  ;;  %v2315_v9 = vpop.eup %1534  ;;  %1546 = vpow2.f32 %v878_v34  ;;  %v894_v34 = vmul.f32 1.442695, %v787_v14 }
 0x315   : >> { %v2319_v5 = vpop.eup %1536  ;;  %v985_v18 = vadd.f32 %v2315_v9, %v984_v38  ;;  %1548 = vpow2.f32 %v882_v42 }
 0x316   : >> { %v963_v13 = vadd.f32 %v2303_v10, %v962_v35  ;;  %v2323_v11 = vpop.eup %1538  ;;  %v886_v35 = vmul.f32 1.442695, %v783_v57  ;;  %v791_v57 = vsub.f32 %v1961_v33, %v2135_v7  ;;  %v795_v33 = vsub.f32 %v1977_v41, %v2135_v7 }
 0x317   : >> { %v2327_v15 = vpop.eup %1540  ;;  %v986_v21 = vadd.f32 %v2323_v11, %v985_v18  ;;  %v799_v41 = vsub.f32 %v1999_v4, %v2135_v7 }
 0x318   : >> { %v964_v58 = vadd.f32 %v2311_v52, %v963_v13  ;;  %v2331_v59 = vpop.eup %1542  ;;  %v890_v13 = vmul.f32 1.442695, %v785_v61  ;;  %1550 = vpow2.f32 %v886_v35  ;;  %v898_v61 = vmul.f32 1.442695, %v789_v63 }
 0x319   : >> { %v987_v36 = vadd.f32 %v2331_v59, %v986_v21  ;;  %v2337_v25 = vpop.eup %1544  ;;  %v902_v14 = vmul.f32 1.442695, %v791_v57  ;;  %v906_v63 = vmul.f32 1.442695, %v793_v29  ;;  %v910_v57 = vmul.f32 1.442695, %v795_v33 }
 0x31a   : >> { %v965_v39 = vadd.f32 %v2319_v5, %v964_v58  ;;  %v2342_v17 = vpop.eup %1546  ;;  %1552 = vpow2.f32 %v890_v13  ;;  %v914_v29 = vmul.f32 1.442695, %v797_v37  ;;  %v918_v4 = vmul.f32 1.442695, %v799_v41 }
 0x31b   : >> { %v988_v18 = vadd.f32 %v2337_v25, %v987_v36  ;;  %v2347_v21 = vpop.eup %1548  ;;  %1554 = vpow2.f32 %v894_v34  ;;  %v922_v37 = vmul.f32 1.442695, %v801_v47 }
 0x31c   : >> { %v966_v38 = vadd.f32 %v2327_v15, %v965_v39  ;;  %1556 = vpow2.f32 %v898_v61 }
 0x31d   : >> { %v989_v42 = vadd.f32 %v2342_v17, %v988_v18  ;;  %1558 = vpow2.f32 %v902_v14 }
 0x31e   : >> { %v967_v58 = vrot.slane %v966_v38, 4  ;;  %v2352_v8 = vpop.eup %1550  ;;  %1560 = vpow2.f32 %v906_v63  ;;  %v2693_v63 = vld [vmem:[#allocation32_spill] sm:$0xff] }
 0x31f   : >> { %v990_v36 = vadd.f32 %v2347_v21, %v989_v42  ;;  %1562 = vpow2.f32 %v910_v57 }
 0x320   : >> { %v968_v39 = vadd.f32 %v967_v58, %v966_v38  ;;  %v2357_v58 = vpop.eup %1552 }
 0x321   : >> { %v991_v38 = vadd.f32 %v2352_v8, %v990_v36  ;;  %v2362_v42 = vpop.eup %1554 }
 0x322   : >> { %v969_v35 = vrot.slane %v968_v39, 2  ;;  %v2369_v36 = vpop.eup %1556 }
 0x323   : >> { %v992_v18 = vadd.f32 %v2357_v58, %v991_v38  ;;  %v2372_v14 = vpop.eup %1558 }
 0x324   : >> { %v970_v13 = vadd.f32 %v969_v35, %v968_v39  ;;  %v803_v39 = vsub.f32 %v2040_v24, %v2135_v7 }
 0x325   : >> { %v993_v35 = vadd.f32 %v2362_v42, %v992_v18  ;;  %v930_v18 = vmul.f32 1.442695, %v805_v40 }
 0x326   : >> { %v971_v34 = vrot.slane %v970_v13, 1  ;;  %v926_v24 = vmul.f32 1.442695, %v803_v39 }
 0x327   : >> { %v994_v33 = vadd.f32 %v2369_v36, %v993_v35 }
 0x328   : >> { %v972_v61 = vadd.f32 %v971_v34, %v970_v13  ;;  %v807_v13 = vsub.f32 %v2693_v63, %v2135_v7  ;;  %v2379_v34 = vpop.eup %1560 }
 0x329   : >> { %v995_v38 = vadd.f32 %v2372_v14, %v994_v33  ;;  %v2382_v57 = vpop.eup %1562 }
 0x32a   : >> { %1564 = vrcp.f32 %v972_v61  ;;  %v934_v23 = vmul.f32 1.442695, %v807_v13 }
 0x32b   : >> { %1566 = vpow2.f32 %v914_v29  ;;  %v996_v41 = vadd.f32 %v2379_v34, %v995_v38 }
 0x32c   : >> { %1568 = vpow2.f32 %v918_v4 }
 0x32d   : >> { %1570 = vpow2.f32 %v922_v37  ;;  %v997_v47 = vadd.f32 %v2382_v57, %v996_v41 }
 0x32e   : >> { %1572 = vpow2.f32 %v926_v24 }
 0x32f   : >> { %1574 = vpow2.f32 %v930_v18 }
 0x330   : >> { %v2384_v61 = vpop.eup %1564  ;;  %1576 = vpow2.f32 %v934_v23 }
 0x331   : >> { %v2387_v29 = vpop.eup %1566  ;;  %v1042_v7 = vmul.f32 %v2384_v61, %v2186_v6  ;;  %v1074_v39 = vmul.f32 %v2384_v61, %v2327_v15  ;;  %v1040_v35 = vmul.f32 %v2384_v61, %v2179_v3  ;;  %v1072_v4 = vmul.f32 %v2384_v61, %v2319_v5 }
 0x332   : >> { %v998_v33 = vadd.f32 %v2387_v29, %v997_v47  ;;  %v1038_v40 = vmul.f32 %v2384_v61, %v2172_v30  ;;  %v1070_v37 = vmul.f32 %v2384_v61, %v2311_v52  ;;  %v1036_v6 = vmul.f32 %v2384_v61, %v2165_v22  ;;  %v2404_v63 = vpop.eup %1568 }
 0x333   : >> { %1097 = vmatpush.msra.mxu0 %v1042_v7  ;;  %1120 = vmatpush.msra.mxu1 %v1074_v39  ;;  %v1068_v3 = vmul.f32 %v2384_v61, %v2303_v10  ;;  %v1034_v5 = vmul.f32 %v2384_v61, %v2158_v51  ;;  %v1066_v30 = vmul.f32 %v2384_v61, %v2295_v43  ;;  %v2415_v22 = vpop.eup %1570 }
 0x334   : >> { %v999_v15 = vadd.f32 %v2404_v63, %v998_v33  ;;  %v1064_v52 = vmul.f32 %v2384_v61, %v2287_v19  ;;  %v2417_v13 = vpop.eup %1572  ;;  %v1054_v51 = vmul.f32 %v2384_v61, %v2241_v0  ;;  %v1052_v24 = vmul.f32 %v2384_v61, %v2231_v26 }
 0x335   : >> { %1098 = vmatpush.msra.mxu0 %v1040_v35  ;;  %1121 = vmatpush.msra.mxu1 %v1072_v4  ;;  %v2425_v19 = vpop.eup %1574  ;;  %v1050_v38 = vmul.f32 %v2384_v61, %v2221_v44  ;;  %v1048_v41 = vmul.f32 %v2384_v61, %v2210_v48  ;;  %v1046_v0 = vmul.f32 %v2384_v61, %v2195_v56 }
 0x336   : >> { %v1000_v10 = vadd.f32 %v2415_v22, %v999_v15  ;;  %v1577_v23 = vpop.eup %1576  ;;  %v1032_v26 = vmul.f32 %v2384_v61, %v2151_v60  ;;  %v1044_v47 = vmul.f32 %v2384_v61, %v2190_v32  ;;  %v1030_v48 = vmul.f32 %v2384_v61, %v2144_v53 }
 0x337   : >> { %1099 = vmatpush.msra.mxu0 %v1038_v40  ;;  %1122 = vmatpush.msra.mxu1 %v1070_v37  ;;  %v1062_v44 = vmul.f32 %v2384_v61, %v2279_v31  ;;  %v1028_v56 = vmul.f32 %v2384_v61, %v2137_v62  ;;  %v1060_v60 = vmul.f32 %v2384_v61, %v2271_v46 }
 0x338   : >> { %v1001_v43 = vadd.f32 %v2417_v13, %v1000_v10  ;;  %v1026_v32 = vmul.f32 %v2384_v61, %v2130_v50  ;;  %v1058_v53 = vmul.f32 %v2384_v61, %v2261_v12  ;;  %v1024_v31 = vmul.f32 %v2384_v61, %v2125_v2  ;;  %v2699_v10 = vld [vmem:[#allocation11_spill] sm:$0xff] }
 0x339   : >> { %1100 = vmatpush.msra.mxu0 %v1036_v6  ;;  %1123 = vmatpush.msra.mxu1 %v1068_v3  ;;  %v1056_v62 = vmul.f32 %v2384_v61, %v2251_v27  ;;  %v1022_v46 = vmul.f32 %v2384_v61, %v2120_v20  ;;  %v1020_v50 = vmul.f32 %v2384_v61, %v2115_v55  ;;  %v2694_v27 = vld [vmem:[#allocation26_spill] sm:$0xff]  ;;  %v2695_v6 = vld [vmem:[#allocation15_spill] sm:$0xff]  ;;  %v2696_v3 = vld [vmem:[#allocation12_spill] sm:$0xff] }
 0x33a   : >> { %v1002_v18 = vadd.f32 %v2425_v19, %v1001_v43  ;;  %v1018_v2 = vmul.f32 %v2384_v61, %v2110_v1  ;;  %v1016_v37 = vmul.f32 %v2384_v61, %v2694_v27  ;;  %v1084_v20 = vrot.slane %v2695_v6, 1  ;;  %v2698_v55 = vld [vmem:[#allocation24_spill] sm:$0xff] }
 0x33b   : >> { %1101 = vmatpush.msra.mxu0 %v1034_v5  ;;  %1124 = vmatpush.msra.mxu1 %v1066_v30  ;;  %v1086_v5 = vrot.slane %v2696_v3, 1  ;;  %v2697_v30 = vld [vmem:[#allocation17_spill] sm:$0xff]  ;;  %v1083_v1 = vrot.slane %v2699_v10, 1  ;;  %v1580_v3 = vld [vmem:[%s1775_s29] sm:$0xff]  ;;  %v1581_v10 = vld [vmem:[%s1775_s29 + $0x10] sm:$0xff] }
 0x33c   : >> { %v1003_v7 = vadd.f32 %v1577_v23, %v1002_v18  ;;  %v1087_v15 = vrot.slane %v2697_v30, 1 }
 0x33d   : >> { %1102 = vmatpush.msra.mxu0 %v1032_v26  ;;  %1125 = vmatpush.msra.mxu1 %v1064_v52  ;;  %v1014_v52 = vmul.f32 %v2384_v61, %v2698_v55 }
 0x33e   : >> { %v1004_v39 = vrot.slane %v1003_v7, 4 }
 0x33f   : >> { %1103 = vmatpush.msra.mxu0 %v1030_v48  ;;  %1126 = vmatpush.msra.mxu1 %v1062_v44  ;;  %v2702_v44 = vld [vmem:[#allocation19_spill] sm:$0xff] }
 0x340   : >> { %v1005_v35 = vadd.f32 %v1004_v39, %v1003_v7  ;;  %v2701_v7 = vld [vmem:[#allocation16_spill] sm:$0xff]  ;;  %v1091_v39 = vrot.slane %v2702_v44, 1 }
 0x341   : >> { %1104 = vmatpush.msra.mxu0 %v1028_v56  ;;  %1127 = vmatpush.msra.mxu1 %v1060_v60  ;;  %v1089_v48 = vrot.slane %v2701_v7, 1 }
 0x342   : >> { %v1006_v4 = vrot.slane %v1005_v35, 2 }
 0x343   : >> { %1105 = vmatpush.msra.mxu0 %v1026_v32  ;;  %1128 = vmatpush.msra.mxu1 %v1058_v53 }
 0x344   : >> { %v1007_v33 = vadd.f32 %v1006_v4, %v1005_v35  ;;  %v2706_v4 = vld [vmem:[#allocation21_spill] sm:$0xff] }
 0x345   : >> { %1106 = vmatpush.msra.mxu0 %v1024_v31  ;;  %1129 = vmatpush.msra.mxu1 %v1056_v62 }
 0x346   : >> { %v1008_v40 = vrot.slane %v1007_v33, 1 }
 0x347   : >> { %1107 = vmatpush.msra.mxu0 %v1022_v46  ;;  %1130 = vmatpush.msra.mxu1 %v1054_v51  ;;  %v2700_v51 = vld [vmem:[#allocation22_spill] sm:$0xff]  ;;  %v2709_v46 = vld [vmem:[#allocation13_spill] sm:$0xff] }
 0x348   : >> { %v1009_v12 = vadd.f32 %v1008_v40, %v1007_v33  ;;  %v1012_v43 = vmul.f32 %v2384_v61, %v2700_v51  ;;  %v2708_v33 = vld [vmem:[#allocation20_spill] sm:$0xff] }
 0x349   : >> { %1108 = vmatpush.msra.mxu0 %v1020_v50  ;;  %1131 = vmatpush.msra.mxu1 %v1052_v24  ;;  %v2710_v50 = vld [vmem:[#allocation29_spill] sm:$0xff] }
 0x34a   : >> { %1578 = vrcp.f32 %v1009_v12 }
 0x34b   : >> { %1109 = vmatpush.msra.mxu0 %v1018_v2  ;;  %1132 = vmatpush.msra.mxu1 %v1050_v38  ;;  %v2473_v38 = vsel %vm1082_vm2, %v1083_v1, %v1084_v20 }
 0x34d   : >> { %1110 = vmatpush.msra.mxu0 %v1016_v37  ;;  %1133 = vmatpush.msra.mxu1 %v1048_v41  ;;  %v2476_v41 = vsel %vm1082_vm2, %v1086_v5, %v1087_v15  ;;  %v1189_v37 = vstv %s1760_s11 }
 0x34f   : >> { %1111 = vmatpush.msra.mxu0 %v1014_v52  ;;  %1134 = vmatpush.msra.mxu1 %v1046_v0 }
 0x350   : >> { %v2470_v24 = vpop.eup %1578 }
 0x351   : >> { %1112 = vmatpush.msra.mxu0 %v1012_v43  ;;  %1135 = vmatpush.msra.mxu1 %v1044_v47  ;;  %v1043_v18 = vmul.f32 %v2470_v24, %v2331_v59  ;;  %v1075_v26 = vmul.f32 %v2470_v24, %v1577_v23  ;;  %v1073_v61 = vmul.f32 %v2470_v24, %v2425_v19 }
 0x352   : >> { %1113 = vmatmul.f32.vlgmr.msra.gmra.mxu0 %v2473_v38  ;;  %1136 = vmatmul.f32.vlgmr.msra.gmra.mxu1 %v2476_v41  ;;  %v1039_v0 = vmul.f32 %v2470_v24, %v2315_v9  ;;  %v1041_v47 = vmul.f32 %v2470_v24, %v2323_v11  ;;  %v1037_v59 = vmul.f32 %v2470_v24, %v2307_v49 }
 0x353   : >> { %1143 = vmatpush.msrb.mxu0 %v1043_v18  ;;  %1166 = vmatpush.msrb.mxu1 %v1075_v26  ;;  %v1035_v23 = vmul.f32 %v2470_v24, %v2299_v16  ;;  %v1071_v9 = vmul.f32 %v2470_v24, %v2417_v13  ;;  %v1069_v11 = vmul.f32 %v2470_v24, %v2415_v22 }
 0x354   : >> { %v1055_v49 = vmul.f32 %v2470_v24, %v2362_v42  ;;  %v1090_v19 = vsel %vm1082_vm2, %v1084_v20, %v1089_v48  ;;  %v1092_v16 = vsel %vm1082_vm2, %v1087_v15, %v1091_v39  ;;  %v1053_v56 = vmul.f32 %v2470_v24, %v2357_v58 }
 0x355   : >> { %1144 = vmatpush.msrb.mxu0 %v1041_v47  ;;  %1167 = vmatpush.msrb.mxu1 %v1073_v61  ;;  %v1051_v60 = vmul.f32 %v2470_v24, %v2352_v8  ;;  %v1067_v13 = vmul.f32 %v2470_v24, %v2404_v63  ;;  %v1049_v22 = vmul.f32 %v2470_v24, %v2347_v21 }
 0x356   : >> { %v1047_v42 = vmul.f32 %v2470_v24, %v2342_v17  ;;  %v1045_v35 = vmul.f32 %v2470_v24, %v2337_v25  ;;  %v1033_v8 = vmul.f32 %v2470_v24, %v2291_v45  ;;  %v1065_v58 = vmul.f32 %v2470_v24, %v2387_v29  ;;  %v2703_v45 = vld [vmem:[#allocation28_spill] sm:$0xff] }
 0x357   : >> { %1145 = vmatpush.msrb.mxu0 %v1039_v0  ;;  %1168 = vmatpush.msrb.mxu1 %v1071_v9  ;;  %v1031_v21 = vmul.f32 %v2470_v24, %v2283_v54  ;;  %v1063_v17 = vmul.f32 %v2470_v24, %v2382_v57  ;;  %v1029_v25 = vmul.f32 %v2470_v24, %v2275_v28  ;;  %v2704_v54 = vld [vmem:[#allocation27_spill] sm:$0xff] }
 0x358   : >> { %v1061_v63 = vmul.f32 %v2470_v24, %v2379_v34  ;;  %v1027_v29 = vmul.f32 %v2470_v24, %v2703_v45  ;;  %v1059_v32 = vmul.f32 %v2470_v24, %v2372_v14  ;;  %v1025_v57 = vmul.f32 %v2470_v24, %v2704_v54  ;;  %v2705_v28 = vld [vmem:[#allocation23_spill] sm:$0xff]  ;;  %v2707_v14 = vld [vmem:[#allocation25_spill] sm:$0xff] }
 0x359   : >> { %1146 = vmatpush.msrb.mxu0 %v1037_v59  ;;  %1169 = vmatpush.msrb.mxu1 %v1069_v11  ;;  %v1057_v53 = vmul.f32 %v2470_v24, %v2369_v36  ;;  %v1023_v34 = vmul.f32 %v2470_v24, %v2705_v28  ;;  %v1021_v31 = vmul.f32 %v2470_v24, %v2706_v4  ;;  %v1583_v59 = vld [vmem:[%s1775_s29 + $0x18] sm:$0xff] }
 0x35a   : >> { %1116 = vmatmul.f32.gmra.mxu0 %v1090_v19  ;;  %1139 = vmatmul.f32.gmra.mxu1 %v1092_v16  ;;  %v1019_v62 = vmul.f32 %v2470_v24, %v2707_v14  ;;  %v1017_v36 = vmul.f32 %v2470_v24, %v2708_v33  ;;  %v1015_v40 = vmul.f32 %v2470_v24, %v2709_v46 }
 0x35b   : >> { %1147 = vmatpush.msrb.mxu0 %v1035_v23  ;;  %1170 = vmatpush.msrb.mxu1 %v1067_v13  ;;  %v1013_v12 = vmul.f32 %v2470_v24, %v2710_v50 }
 0x35d   : >> { %1148 = vmatpush.msrb.mxu0 %v1033_v8  ;;  %1171 = vmatpush.msrb.mxu1 %v1065_v58 }
 0x35f   : >> { %1149 = vmatpush.msrb.mxu0 %v1031_v21  ;;  %1172 = vmatpush.msrb.mxu1 %v1063_v17 }
 0x361   : >> { %1150 = vmatpush.msrb.mxu0 %v1029_v25  ;;  %1173 = vmatpush.msrb.mxu1 %v1061_v63 }
 0x363   : >> { %1151 = vmatpush.msrb.mxu0 %v1027_v29  ;;  %1174 = vmatpush.msrb.mxu1 %v1059_v32 }
 0x365   : >> { %1152 = vmatpush.msrb.mxu0 %v1025_v57  ;;  %1175 = vmatpush.msrb.mxu1 %v1057_v53 }
 0x367   : >> { %1153 = vmatpush.msrb.mxu0 %v1023_v34  ;;  %1176 = vmatpush.msrb.mxu1 %v1055_v49 }
 0x369   : >> { %1154 = vmatpush.msrb.mxu0 %v1021_v31  ;;  %1177 = vmatpush.msrb.mxu1 %v1053_v56 }
 0x36b   : >> { %1155 = vmatpush.msrb.mxu0 %v1019_v62  ;;  %1178 = vmatpush.msrb.mxu1 %v1051_v60 }
 0x36d   : >> { %1156 = vmatpush.msrb.mxu0 %v1017_v36  ;;  %1179 = vmatpush.msrb.mxu1 %v1049_v22 }
 0x36f   : >> { %1157 = vmatpush.msrb.mxu0 %v1015_v40  ;;  %1180 = vmatpush.msrb.mxu1 %v1047_v42 }
 0x371   : >> { %1158 = vmatpush.msrb.mxu0 %v1013_v12  ;;  %1181 = vmatpush.msrb.mxu1 %v1045_v35 }
 0x372   : >> { %1159 = vmatmul.f32.vlgmr.msrb.gmra.mxu0 %v2473_v38  ;;  %1182 = vmatmul.f32.vlgmr.msrb.gmra.mxu1 %v2476_v41  ;;  %v1582_v41 = vld [vmem:[%s1775_s29 + $0x8] sm:$0xff] }
 0x37a   : >> { %1162 = vmatmul.f32.gmra.mxu0 %v1090_v19  ;;  %1185 = vmatmul.f32.gmra.mxu1 %v1092_v16 }
 0x3cf   : >> { %v1114_v2 = vpop.f32.mrf.mxu0  ;;  %v1137_v27 = vpop.f32.mrf.mxu1 }
 0x3d0   : >> { %v1138_v6 = vadd.f32 %v1137_v27, %v1114_v2 }
 0x3d2   : >> { %v1190_v20 = vmul.f32 %v1189_v37, %v1138_v6 }
 0x3d4   : >> { %v1194_v5 = vadd.f32 %v1580_v3, %v1190_v20 }
 0x3d6   : >> { %1201 = vst [vmem:[%s1200_s30] sm:$0xff] %v1194_v5 }
 0x3d7   : >> { %v1117_v30 = vpop.f32.mrf.mxu0  ;;  %v1140_v15 = vpop.f32.mrf.mxu1 }
 0x3d8   : >> { %v1141_v55 = vadd.f32 %v1140_v15, %v1117_v30 }
 0x3da   : >> { %v1192_v52 = vmul.f32 %v1189_v37, %v1141_v55 }
 0x3dc   : >> { %v1196_v1 = vadd.f32 %v1581_v10, %v1192_v52 }
 0x3de   : >> { %1203 = vst [vmem:[%s1200_s30 + $0x10] sm:$0xff] %v1196_v1 }
 0x3ef   : >> { %v1160_v51 = vpop.f32.mrf.mxu0  ;;  %v1183_v43 = vpop.f32.mrf.mxu1 }
 0x3f0   : >> { %v1184_v24 = vadd.f32 %v1183_v43, %v1160_v51 }
 0x3f2   : >> { %v1191_v38 = vmul.f32 %v1189_v37, %v1184_v24 }
 0x3f4   : >> { %v1195_v18 = vadd.f32 %v1582_v41, %v1191_v38 }
 0x3f6   : >> { %1202 = vst [vmem:[%s1200_s30 + $0x8] sm:$0xff] %v1195_v18 }
 0x3f7   : >> { %v1163_v26 = vpop.f32.mrf.mxu0  ;;  %v1186_v61 = vpop.f32.mrf.mxu1 }
 0x3f8   : >> { %v1187_v0 = vadd.f32 %v1186_v61, %v1163_v26 }
 0x3fa   : >> { %v1193_v47 = vmul.f32 %v1189_v37, %v1187_v0  ;;  %186 = sbr.rel (!%p184_p11) target bundleno = 28 (0x1c), region = 76 }
 0x3fc   : >> { %v1197_v23 = vadd.f32 %v1583_v59, %v1193_v47 }
 0x3fe   : >> { %1204 = vst [vmem:[%s1200_s30 + $0x18] sm:$0xff] %v1197_v23 }
 0x3ff   : > { %1611 = shalt.err (!%p1608_p4)
}
 0x400   : > { %s1656_s25 = smov 256   ;;  %s1657_s6 = smov 16  }
 0x401   : > { %1398 = dma.vmem_to_hbm [thread:$0]  (%p1719_p5), %s1220_s9, 1024, %s1222_s10, %s1206_s12, %s1656_s25, %s1656_s25, %s1657_s6  }
 0x402 PF: > { %p1404_p7 = scmp.ge.s32.totalorder %s1650_s17, 2  ;;  %s1236_s21 = sand.u32 1, %s1638_s14  }
 0x403   : > { %s1237_s29 = scalar_lea.sflag [#allocation4], %s1236_s21 }
 0x404   : > { %p1401_p8 = pnand %p1404_p7, %p1723_p6 }
 0x406   : > { %p1402_p9 = pneg %p1401_p8 }
 0x408   : > { %1633 = dma.done.wait (%p1402_p9), %s1237_s29, 1024  }
 0x409   : > { %1635 = vsyncadd (%p1402_p9), %s1237_s29, 4294966272  ;;  %p14_p10 = scmp.ge.s32.totalorder %s1706_s19, 4   ;;  %s2711_s14 = smov %s1642_s15 }
 0x40a   : > { %s2712_s15 = smov %s1646_s16  ;;  %s2713_s16 = smov %s1717_s22 }
 0x40b   : > { %s2714_s17 = smov %s1706_s19  ;;  %16 = sbr.rel (!%p14_p10) target bundleno = 5 (0x5), region = 87 }
 0x410   :  { %1243 = vsyncpa [#allocation4], 1 }
 0x411   :  { %1245 = vsyncpa [#allocation4 + $0x1], 1 }

</bundles_post_ra>
